<compile_context>
chip_gen: v7x
topology: tpu7x:2x2x1
jax: 0.10.0
libtpu: 0.0.40
codegen_flags: <defaults>
</compile_context>

<pallas_src>
import numpy as np
import jax
import jax.numpy as jnp
from jax.experimental import pallas as pl
from jax.experimental.pallas import tpu as pltpu


# ----------------------------- small config ------------------------------- #
B, S = 2, 128                # batch, sequence  -> M = 256 token rows per call
D = 128                      # model dim   (multiple of 128 lanes)
MULTIPLE_OF = 128
_h = int(2 * (4 * D) / 3)                                         # torch: int(2*hidden/3)
HIDDEN = MULTIPLE_OF * ((_h + MULTIPLE_OF - 1) // MULTIPLE_OF)     # 384 (multiple of 128)
TM = 128                     # token-rows per grid step (parallel axis -> 2 TCs on v7x)


# ------------------------------ Pallas kernel ------------------------------ #
def ffn_kernel(x_ref, w13_ref, w2_ref, o_ref):
    # x_ref:  (TM, D) bf16        w13_ref: (D, 2*HIDDEN) bf16   [w1 | w3] fused
    # w2_ref: (HIDDEN, D) bf16    o_ref:   (TM, D) bf16
    x = x_ref[...]

    # Fused gate/up projection: one MXU push for w1 and w3 together.
    # bf16 inputs, f32 accumulation.
    x13 = jnp.dot(x, w13_ref[...], preferred_element_type=jnp.float32)
    x1 = x13[:, :HIDDEN]          # static, 128-lane-aligned slices (no layout copies)
    x3 = x13[:, HIDDEN:]

    # silu_and_mul in f32: silu(x1) * x3   (sigmoid goes to the EUP slot)
    h = x1 * jax.nn.sigmoid(x1) * x3

    # Down projection: cast h to bf16 only at the MXU input, accumulate in f32.
    o_ref[...] = jnp.dot(h.astype(jnp.bfloat16), w2_ref[...],
                         preferred_element_type=jnp.float32).astype(o_ref.dtype)


# ------------------------------ wrapper ------------------------------------ #
def feed_forward(x, w13, w2):
    """x: (B, S, D) bf16; w13: (D, 2*HIDDEN) bf16; w2: (HIDDEN, D) bf16."""
    b, s, d = x.shape
    m = b * s
    assert m % TM == 0, "token count must be a multiple of the M tile"
    x2d = x.reshape(m, d)                      # fold batch -> lane-dense (M, 128) slab
    two_h = w13.shape[1]
    hidden = w2.shape[0]

    flops = 2 * m * d * two_h + 2 * m * hidden * d
    bytes_accessed = (x2d.size * x2d.dtype.itemsize
                      + w13.size * w13.dtype.itemsize
                      + w2.size * w2.dtype.itemsize
                      + m * d * jnp.dtype(jnp.bfloat16).itemsize)

    out2d = pl.pallas_call(
        ffn_kernel,
        out_shape=jax.ShapeDtypeStruct((m, d), jnp.bfloat16),
        grid=(m // TM,),
        in_specs=[
            pl.BlockSpec((TM, d), lambda i: (i, 0)),        # activation tile per step
            pl.BlockSpec((d, two_h), lambda i: (0, 0)),     # weights: constant index ->
            pl.BlockSpec((hidden, d), lambda i: (0, 0)),    #   resident in VMEM, no re-DMA
        ],
        out_specs=pl.BlockSpec((TM, d), lambda i: (i, 0)),
        compiler_params=pltpu.CompilerParams(
            dimension_semantics=("parallel",)),             # shards M tiles across v7x TCs
        cost_estimate=pl.CostEstimate(
            flops=flops,
            transcendentals=m * hidden,                     # one sigmoid per hidden elem
            bytes_accessed=bytes_accessed),
    )(x2d, w13, w2)
    return out2d.reshape(b, s, d)


# ------------------------------ pure-JAX reference -------------------------- #
def reference(x, w1, w2, w3):
    """f32 reference (same bf16-rounded inputs, f32 math throughout)."""
    x1 = x @ w1
    x3 = x @ w3
    return (x1 * jax.nn.sigmoid(x1) * x3) @ w2


# ----------------------------------- main ----------------------------------- #
if __name__ == "__main__":
    key = jax.random.PRNGKey(0)
    kx, k1, k2, k3 = jax.random.split(key, 4)
    scale = 0.05
    # Build in f32, then quantize to bf16 (the storage/compute dtype of the kernel).
    x = jax.random.normal(kx, (B, S, D), jnp.float32).astype(jnp.bfloat16)
    # (in, out) layouts (pre-transposed nn.Linear weights)
    w1 = (scale * jax.random.normal(k1, (D, HIDDEN), jnp.float32)).astype(jnp.bfloat16)
    w3 = (scale * jax.random.normal(k3, (D, HIDDEN), jnp.float32)).astype(jnp.bfloat16)
    w2 = (scale * jax.random.normal(k2, (HIDDEN, D), jnp.float32)).astype(jnp.bfloat16)
    w13 = jnp.concatenate([w1, w3], axis=1)        # fused (D, 2*HIDDEN)

    out = jax.block_until_ready(feed_forward(x, w13, w2))

    # Reference: same bf16-rounded inputs, f32 arithmetic.
    ref = reference(x.astype(jnp.float32), w1.astype(jnp.float32),
                    w2.astype(jnp.float32), w3.astype(jnp.float32))
    np.testing.assert_allclose(np.asarray(out, dtype=np.float32), np.asarray(ref),
                               rtol=2e-2, atol=2e-2)

    print("KERNEL_OK")
</pallas_src>

<mosaic_0001>
module attributes {stable_mosaic.version = 11 : i64} {
  func.func @ffn_kernel(%arg0: i32, %arg1: memref<128x128xbf16, #tpu.memory_space<vmem>>, %arg2: memref<128x768xbf16, #tpu.memory_space<vmem>>, %arg3: memref<384x128xbf16, #tpu.memory_space<vmem>>, %arg4: memref<128x128xbf16, #tpu.memory_space<vmem>>) attributes {dimension_semantics = [#tpu.dimension_semantics<parallel>], iteration_bounds = array<i64: 2>, scalar_prefetch = 0 : i64, scratch_operands = 0 : i64, tpu.core_type = #tpu.core_type<tc>, window_params = [{transform_indices = @transform_0, window_bounds = array<i64: 128, 128>}, {pipeline_mode = #tpu.pipeline_mode<synchronous>, transform_indices = @transform_1, window_bounds = array<i64: 128, 768>}, {pipeline_mode = #tpu.pipeline_mode<synchronous>, transform_indices = @transform_2, window_bounds = array<i64: 384, 128>}, {transform_indices = @transform_3, window_bounds = array<i64: 128, 128>}]} {
    %c0 = arith.constant 0 : index
    %c0_0 = arith.constant 0 : index
    %0 = vector.load %arg1[%c0, %c0_0] : memref<128x128xbf16, #tpu.memory_space<vmem>>, vector<128x128xbf16>
    %c0_1 = arith.constant 0 : index
    %c0_2 = arith.constant 0 : index
    %1 = vector.load %arg2[%c0_1, %c0_2] : memref<128x768xbf16, #tpu.memory_space<vmem>>, vector<128x768xbf16>
    %cst = arith.constant dense<0.000000e+00> : vector<128x768xf32>
    %2 = tpu.matmul %0, %1, %cst {dimension_numbers = #tpu.dot_dimension_numbers<[1], [0], [0], [1], [0, 0, 1, 1], [], []>} : vector<128x128xbf16>, vector<128x768xbf16>, vector<128x768xf32> -> vector<128x768xf32>
    %3 = vector.extract_strided_slice %2 {offsets = [0, 0], sizes = [128, 384], strides = [1, 1]} : vector<128x768xf32> to vector<128x384xf32>
    %4 = vector.extract_strided_slice %2 {offsets = [0, 384], sizes = [128, 384], strides = [1, 1]} : vector<128x768xf32> to vector<128x384xf32>
    %5 = arith.negf %3 : vector<128x384xf32>
    %6 = math.exp %5 : vector<128x384xf32>
    %cst_3 = arith.constant 1.000000e+00 : f32
    %7 = vector.broadcast %cst_3 : f32 to vector<128x384xf32>
    %8 = arith.addf %7, %6 : vector<128x384xf32>
    %9 = arith.divf %7, %8 : vector<128x384xf32>
    %10 = arith.mulf %3, %9 : vector<128x384xf32>
    %11 = arith.mulf %10, %4 : vector<128x384xf32>
    %12 = arith.truncf %11 : vector<128x384xf32> to vector<128x384xbf16>
    %c0_4 = arith.constant 0 : index
    %c0_5 = arith.constant 0 : index
    %13 = vector.load %arg3[%c0_4, %c0_5] : memref<384x128xbf16, #tpu.memory_space<vmem>>, vector<384x128xbf16>
    %cst_6 = arith.constant dense<0.000000e+00> : vector<128x128xf32>
    %14 = tpu.matmul %12, %13, %cst_6 {dimension_numbers = #tpu.dot_dimension_numbers<[1], [0], [0], [1], [0, 0, 1, 1], [], []>} : vector<128x384xbf16>, vector<384x128xbf16>, vector<128x128xf32> -> vector<128x128xf32>
    %15 = arith.truncf %14 : vector<128x128xf32> to vector<128x128xbf16>
    %c0_7 = arith.constant 0 : index
    %c0_8 = arith.constant 0 : index
    %16 = vector.load %arg4[%c0_7, %c0_8] : memref<128x128xbf16, #tpu.memory_space<vmem>>, vector<128x128xbf16>
    tpu.vector_store %arg4[%c0_7, %c0_8], %15 {strides = array<i32>} : memref<128x128xbf16, #tpu.memory_space<vmem>>, vector<128x128xbf16>,
    return
  }
  func.func @transform_0(%arg0: i32) -> (i32, i32) {
    %c0_i32 = arith.constant 0 : i32
    %c0_i32_0 = arith.constant 0 : i32
    return %arg0, %c0_i32 : i32, i32
  }
  func.func @transform_1(%arg0: i32) -> (i32, i32) {
    %c0_i32 = arith.constant 0 : i32
    %c0_i32_0 = arith.constant 0 : i32
    %c0_i32_1 = arith.constant 0 : i32
    return %c0_i32, %c0_i32_0 : i32, i32
  }
  func.func @transform_2(%arg0: i32) -> (i32, i32) {
    %c0_i32 = arith.constant 0 : i32
    %c0_i32_0 = arith.constant 0 : i32
    %c0_i32_1 = arith.constant 0 : i32
    return %c0_i32, %c0_i32_0 : i32, i32
  }
  func.func @transform_3(%arg0: i32) -> (i32, i32) {
    %c0_i32 = arith.constant 0 : i32
    %c0_i32_0 = arith.constant 0 : i32
    return %arg0, %c0_i32 : i32, i32
  }
}

</mosaic_0001>

<bundles_post_ra>
// kernel: tpu_custom_call.1
= control target key start
LH: loop header
LB: loop body
LE: loop exit
PB: predicated region body
PF: predicated region fallthrough
CT: control target
= control target key end

     0   :  { %8 = vsyncpa [#allocation3], 0  ;;  %s3507_s0 = inlined_call_operand.hbm [shape: bf16[256,128], index: 0, kind: input, shape index: {}]   ;;  %s3508_s1 = inlined_call_operand.hbm [shape: bf16[128,768], index: 1, kind: input, shape index: {}]   ;;  %s3509_s2 = inlined_call_operand.hbm [shape: bf16[384,128], index: 2, kind: input, shape index: {}]   ;;  %s3510_s3 = inlined_call_operand.hbm [shape: bf16[256,128], index: 3, kind: output, shape index: {}]  }
   0x1   :  { %10 = vsyncpa [#allocation3 + $0x1], 0 }
   0x2   :  { %11 = vsyncpa [#allocation6], 0 }
   0x3   :  { %12 = vsyncpa [#allocation4], 0 }
   0x4   :  { %14 = vsyncpa [#allocation4 + $0x1], 0  ;;  %s2806_s12 = smov 0   ;;  %s2808_s13 = smov 0  }
   0x5   :  { %s2810_s14 = smov 0   ;;  %s2812_s15 = smov 0  }
   0x6 LB: > { %s2827_s16 = sadd.s32 4294967295, %s2773_s15   ;;  %s1892_s17 = sadd.s32 4294967294, %s2773_s15   ;;  %s2773_s15 = sphi %s2812_s15, %s3600_s15   ;;  %s2769_s14 = sphi %s2810_s14, %s3599_s14   ;;  %s2765_s13 = sphi %s2808_s13, %s3598_s13   ;;  %s2761_s12 = sphi %s2806_s12, %s3597_s12  }
   0x7   : > { %p40_p0 = scmp.ne.s32.totalorder %s2765_s13, %s2761_s12  ;;  %p3511_p1 = scmp.eq.s32.totalorder %s2827_s16, 0 }
   0x8   : > { %p112_p3 = scmp.eq.s32.totalorder %s1892_s17, 1  ;;  %p1893_p5 = scmp.ge.s32.totalorder %s2773_s15, 1 }
   0x9   : > { %p2836_p4 = por %p3511_p1, %p40_p0  ;;  %p119_p7 = scmp.lt.s32.totalorder %s2773_s15, 3 }
   0xa   : > { %p2841_p6 = por %p112_p3, %p40_p0  ;;  %s2775_s21 = smov [#allocation5]  }
   0xb   : > { %s3538_s18 = scalar_select %p2836_p4, 1, 0 }
   0xc   : > { %s3539_s19 = scalar_select %p2841_p6, 1, 0 }
   0xd   : > { %p2846_p8 = pnand %p1893_p5, %p119_p7  ;;  %s131_s22 = sshll.u32 %s2775_s21, 4  ;;  %s2850_s22 = int_to_ptr.vmem [resolvable:$true] %s131_s22 }
   0xe   : > { %s2776_s24 = smov [#allocation7]   ;;  %s2617_s28 = scalar_lea.hbm %s3508_s1, 6144 }
   0xf   : > { %p2259_p9 = pneg %p2846_p8  ;;  %s144_s25 = sshll.u32 %s2776_s24, 4  ;;  %s2861_s25 = int_to_ptr.vmem [resolvable:$true] %s144_s25 }
  0x10   : > { %p2618_p12 = scmp.ne.s32.totalorder %s3508_s1, %s2617_s28  ;;  %p2624_p5 = scmp.lt.u32.totalorder %s2617_s28, %s3508_s1 }
  0x11   : > { %p2857_p11 = pnand %p2259_p9, %p3511_p1 }
  0x13   : > { %p2619_p13 = pneg %p2857_p11 }
  0x15   : > { %p2620_p0 = pnand %p2619_p13, %p2618_p12 }
  0x17   : > { %p2621_p3 = pneg %p2620_p0 }
  0x19   : > { %p2626_p7 = pnand %p2624_p5, %p2621_p3 }
  0x1b   : > { %2629 = shalt.err (!%p2626_p7)
}
  0x1c   : > { %s2630_s6 = scalar_lea.vmem %s2850_s22, 6144  ;;  %p2638_p2 = scmp.lt.s32.totalorder %s2850_s22, %s2850_s22 }
  0x1d   : > { %p2631_p9 = scmp.ne.s32.totalorder %s2850_s22, %s2630_s6  ;;  %p2639_p12 = scmp.lt.s32.totalorder %s2630_s6, %s2630_s6 }
  0x1f   : > { %p2633_p10 = pnand %p2631_p9, %p2619_p13  ;;  %p2640_p0 = por %p2639_p12, %p2638_p2 }
  0x21   : > { %p2634_p1 = pneg %p2633_p10 }
  0x23   : > { %p2641_p6 = pnand %p2640_p0, %p2634_p1 }
  0x25   : > { %2644 = shalt.err (!%p2641_p6)
}
  0x26   : > { %s2777_s7 = smov 384   ;;  %s2778_s8 = smov 24  }
  0x27   : > { %2262 = dma.hbm_to_vmem [thread:$0]  (!%p2857_p11), %s3508_s1, 6144, %s2850_s22, [#allocation6], %s2777_s7, %s2777_s7, %s2778_s8  }
  0x28   : > { %s2645_s21 = scalar_lea.hbm %s3509_s2, 3072 }
  0x29   : > { %p2646_p2 = scmp.ne.s32.totalorder %s3509_s2, %s2645_s21  ;;  %p2652_p10 = scmp.lt.u32.totalorder %s2645_s21, %s3509_s2 }
  0x2b   : > { %p2648_p1 = pnand %p2646_p2, %p2619_p13 }
  0x2d   : > { %p2649_p6 = pneg %p2648_p1 }
  0x2f   : > { %p2654_p3 = pnand %p2652_p10, %p2649_p6 }
  0x31   : > { %2657 = shalt.err (!%p2654_p3)
}
  0x32   : > { %s2658_s22 = scalar_lea.vmem %s2861_s25, 3072  ;;  %p2666_p12 = scmp.lt.s32.totalorder %s2861_s25, %s2861_s25 }
  0x33   : > { %p2659_p5 = scmp.ne.s32.totalorder %s2861_s25, %s2658_s22  ;;  %p2667_p0 = scmp.lt.s32.totalorder %s2658_s22, %s2658_s22 }
  0x35   : > { %p2661_p7 = pnand %p2659_p5, %p2619_p13  ;;  %p2668_p2 = por %p2667_p0, %p2666_p12 }
  0x37   : > { %p2662_p9 = pneg %p2661_p7 }
  0x39   : > { %p2669_p1 = pnand %p2668_p2, %p2662_p9 }
  0x3b   : > { %2672 = shalt.err (!%p2669_p1)
}
  0x3c   : > { %s2779_s29 = smov 64   ;;  %s2780_s30 = smov 4  }
  0x3d   : > { %2265 = dma.hbm_to_vmem [thread:$0]  (!%p2857_p11), %s3509_s2, 3072, %s2861_s25, [#allocation6], %s2779_s29, %s2779_s29, %s2780_s30  }
  0x3e   : > { %s2919_s6 = sadd.s32 1, %s2773_s15   ;;  %s27_s8 = sadd.s32 1, %s2769_s14 }
  0x3f   : > { %s24_s7 = ssub.s32 %s2773_s15, %s2919_s6  ;;  %p34_p6 = scmp.ne.s32.totalorder %s2769_s14, %s2765_s13 }
  0x40   : > { %p25_p13 = scmp.eq.s32.totalorder %s24_s7, 0  ;;  %p35_p10 = scmp.eq.s32.totalorder %s2773_s15, 0 }
  0x41   : > { %p3542_p5 = scmp.eq.s32.totalorder %s2827_s16, 1  ;;  %p2276_p9 = scmp.lt.s32.totalorder %s2773_s15, 2 }
  0x42   : > { %s2928_s9 = scalar_select %p25_p13, %s2769_s14, %s27_s8  }
  0x43   : > { %p36_p3 = por %p35_p10, %p34_p6  ;;  %p2932_p7 = por %p3542_p5, %p34_p6 }
  0x44   : > { %s158_s10 = sand.u32 1, %s2769_s14   ;;  %s2054_s25 = sshll.u32 %s2773_s15, 10 }
  0x45   : > { %s3543_s23 = scalar_select %p2932_p7, 1, 0 }
  0x46   : > { %s1897_s11 = sshll.u32 %s158_s10, 6  ;;  %s2942_s24 = scalar_lea.hbm %s3507_s0, %s2054_s25 }
  0x47   : > { %s162_s26 = scalar_lea.vmem [#allocation2], %s1897_s11  ;;  %p2946_p11 = pnand %p2276_p9, %p36_p3 }
  0x48   : > { %s169_s27 = sshll.u32 %s162_s26, 4  ;;  %s2950_s22 = scalar_lea.sflag [#allocation3], %s158_s10  ;;  %s2944_s27 = int_to_ptr.vmem [resolvable:$true] %s169_s27 }
  0x49   : > { %s2673_s4 = scalar_lea.hbm %s2942_s24, 1024  ;;  %p2675_p0 = pneg %p2946_p11 }
  0x4a   : > { %p2674_p12 = scmp.ne.s32.totalorder %s2942_s24, %s2673_s4  ;;  %s2678_s8 = scalar_lea.hbm %s3507_s0, 2048 }
  0x4b   : > { %p2679_p13 = scmp.lt.u32.totalorder %s2942_s24, %s3507_s0  ;;  %p2680_p6 = scmp.lt.u32.totalorder %s2678_s8, %s2673_s4 }
  0x4c   : > { %p2676_p2 = pnand %p2675_p0, %p2674_p12  ;;  %p2682_p3 = scmp.lt.u32.totalorder %s2673_s4, %s2942_s24 }
  0x4d   : > { %p2681_p10 = por %p2680_p6, %p2679_p13 }
  0x4e   : > { %p2677_p1 = pneg %p2676_p2 }
  0x4f   : > { %p2683_p5 = por %p2682_p3, %p2681_p10 }
  0x51   : > { %p2684_p9 = pnand %p2683_p5, %p2677_p1 }
  0x53   : > { %2687 = shalt.err (!%p2684_p9)
}
  0x54   : > { %s2688_s10 = scalar_lea.vmem %s2944_s27, 1024  ;;  %s2781_s17 = smov [#allocation2]  }
  0x55   : > { %p2689_p12 = scmp.ne.s32.totalorder %s2944_s27, %s2688_s10  ;;  %s2693_s21 = sshll.u32 %s2781_s17, 4  ;;  %s2694_s21 = int_to_ptr.vmem [resolvable:$false] %s2693_s21 }
  0x56   : > { %s2695_s26 = scalar_lea.vmem %s2694_s21, 2048  ;;  %p2696_p4 = scmp.lt.s32.totalorder %s2944_s27, %s2694_s21 }
  0x57   : > { %p2691_p2 = pnand %p2689_p12, %p2675_p0  ;;  %p2697_p13 = scmp.lt.s32.totalorder %s2695_s26, %s2688_s10 }
  0x59   : > { %p2692_p7 = pneg %p2691_p2  ;;  %p2698_p6 = por %p2697_p13, %p2696_p4 }
  0x5b   : > { %p2699_p10 = pnand %p2698_p6, %p2692_p7 }
  0x5d   : > { %2702 = shalt.err (!%p2699_p10)
}
  0x5e   : > { %2269 = dma.hbm_to_vmem [thread:$0]  (!%p2946_p11), %s2942_s24, 1024, %s2944_s27, %s2950_s22, %s2779_s29, %s2779_s29, %s2780_s30  }
  0x5f   : > { %181 = sbr.rel (%p2846_p8) target bundleno = 732 (0x2dc), region = 32 }
  0x66   : > { %s2984_s4 = sand.u32 1, %s2765_s13   ;;  %p3545_p4 = scmp.ne.s32.totalorder %s3538_s18, 0 }
  0x67   : > { %s1901_s5 = sshll.u32 %s2984_s4, 6  ;;  %s184_s7 = scalar_lea.sflag [#allocation3], %s2984_s4 }
  0x68   : > { %s2990_s28 = scalar_lea.vmem [#allocation2], %s1901_s5 }
  0x69   : > { %2748 = dma.done.wait (%p3545_p4), %s184_s7, 1024  }
  0x6a   : > { %2750 = vsyncadd (%p3545_p4), %s184_s7, 4294966272  ;;  %p3546_p7 = scmp.eq.s32.totalorder %s2827_s16, 0 }
  0x6c   : > { %2752 = dma.done.wait (%p3546_p7), [#allocation6], 9216   ;;  %p3547_p8 = pmov %p3546_p7 }
  0x6d   : > { %v2782_v0 = vmov 0   ;;  %v2321_v1 = vld [vmem:[#allocation5 + $0x4] ss:$24 sps:$4 sm:$0xff]   ;;  %v2323_v2 = vld [vmem:[#allocation5] ss:$24 sps:$4 sm:$0xff]   ;;  %v3008_v39 = vld [vmem:[%s2990_s28 + $0x8] sm:$0xff]  }
  0x6e   : > { %2754 = vsyncadd (%p3547_p8), [#allocation6], 4294958080  ;;  %605 = vmatprep.mubr.bf16.mxu0 %v2782_v0  ;;  %718 = vmatprep.mubr.bf16.mxu1 %v2782_v0  ;;  %v2324_v3 = vld [vmem:[#allocation5 + $0x34] ss:$24 sps:$4 sm:$0xff]   ;;  %v2326_v4 = vld [vmem:[#allocation5 + $0x30] ss:$24 sps:$4 sm:$0xff]  }
  0x6f   : > { %573 = vmatprep.subr.bf16.mxu0 %v2321_v1  ;;  %v2327_v5 = vld [vmem:[#allocation5 + $0x64] ss:$24 sps:$4 sm:$0xff]   ;;  %v2329_v6 = vld [vmem:[#allocation5 + $0x60] ss:$24 sps:$4 sm:$0xff]   ;;  %v2330_v7 = vld [vmem:[#allocation5 + $0x94] ss:$24 sps:$4 sm:$0xff]  }
  0x70   : > { %574 = vmatpush1.bf16.msra.mxu0 %v2323_v2  ;;  %v2342_v8 = vld [vmem:[#allocation5 + $0xc] ss:$24 sps:$4 sm:$0xff]   ;;  %v2344_v9 = vld [vmem:[#allocation5 + $0x8] ss:$24 sps:$4 sm:$0xff]   ;;  %v2348_v12 = vld [vmem:[#allocation5 + $0x3c] ss:$24 sps:$4 sm:$0xff]  }
  0x71   : > { %575 = vmatprep.subr.bf16.mxu0 %v2324_v3  ;;  %v2332_v10 = vld [vmem:[#allocation5 + $0x90] ss:$24 sps:$4 sm:$0xff]   ;;  %v2333_v11 = vld [vmem:[#allocation5 + $0xc4] ss:$24 sps:$4 sm:$0xff]   ;;  %686 = vmatprep.subr.bf16.mxu1 %v2342_v8  ;;  %v2335_v14 = vld [vmem:[#allocation5 + $0xc0] ss:$24 sps:$4 sm:$0xff]  }
  0x72   : > { %687 = vmatpush1.bf16.msra.mxu1 %v2344_v9  ;;  %v2350_v13 = vld [vmem:[#allocation5 + $0x38] ss:$24 sps:$4 sm:$0xff]   ;;  %v2336_v15 = vld [vmem:[#allocation5 + $0xf4] ss:$24 sps:$4 sm:$0xff]   ;;  %v2357_v17 = vld [vmem:[#allocation5 + $0x68] ss:$24 sps:$4 sm:$0xff]  }
  0x73   : > { %688 = vmatprep.subr.bf16.mxu1 %v2348_v12  ;;  %v2355_v16 = vld [vmem:[#allocation5 + $0x6c] ss:$24 sps:$4 sm:$0xff]   ;;  %v2358_v18 = vld [vmem:[#allocation5 + $0x9c] ss:$24 sps:$4 sm:$0xff]   ;;  %v2338_v19 = vld [vmem:[#allocation5 + $0xf0] ss:$24 sps:$4 sm:$0xff]  }
  0x74   : > { %576 = vmatpush1.bf16.msra.mxu0 %v2326_v4  ;;  %v2339_v20 = vld [vmem:[#allocation5 + $0x124] ss:$24 sps:$4 sm:$0xff]   ;;  %v2360_v21 = vld [vmem:[#allocation5 + $0x98] ss:$24 sps:$4 sm:$0xff]   ;;  %v2345_v24 = vld [vmem:[#allocation5 + $0x154] ss:$24 sps:$4 sm:$0xff]  }
  0x75   : > { %577 = vmatprep.subr.bf16.mxu0 %v2327_v5  ;;  %v2365_v22 = vld [vmem:[#allocation5 + $0xcc] ss:$24 sps:$4 sm:$0xff]   ;;  %v2341_v23 = vld [vmem:[#allocation5 + $0x120] ss:$24 sps:$4 sm:$0xff]   ;;  %v2368_v26 = vld [vmem:[#allocation5 + $0xfc] ss:$24 sps:$4 sm:$0xff]  }
  0x76   : > { %689 = vmatpush1.bf16.msra.mxu1 %v2350_v13  ;;  %v2367_v25 = vld [vmem:[#allocation5 + $0xc8] ss:$24 sps:$4 sm:$0xff]   ;;  %v2354_v28 = vld [vmem:[#allocation5 + $0x14] ss:$24 sps:$4 sm:$0xff]   ;;  %v2370_v29 = vld [vmem:[#allocation5 + $0xf8] ss:$24 sps:$4 sm:$0xff]  }
  0x77   : > { %690 = vmatprep.subr.bf16.mxu1 %v2355_v16  ;;  %v2347_v27 = vld [vmem:[#allocation5 + $0x150] ss:$24 sps:$4 sm:$0xff]   ;;  %v3003_v30 = vld [vmem:[%s2990_s28] sm:$0xff]   ;;  %v2378_v35 = vld [vmem:[#allocation5 + $0x15c] ss:$24 sps:$4 sm:$0xff]   ;;  %s3446_s18 = scalar_lea.vmem [#allocation8], %s1901_s5 }
  0x78   : > { %578 = vmatpush1.bf16.msra.mxu0 %v2329_v6  ;;  %v2375_v31 = vld [vmem:[#allocation5 + $0x12c] ss:$24 sps:$4 sm:$0xff]   ;;  %v2352_v32 = vld [vmem:[#allocation5 + $0x10] ss:$24 sps:$4 sm:$0xff]   ;;  %v2362_v36 = vld [vmem:[#allocation5 + $0x40] ss:$24 sps:$4 sm:$0xff]  }
  0x79   : > { %579 = vmatprep.subr.bf16.mxu0 %v2330_v7  ;;  %v2364_v33 = vld [vmem:[#allocation5 + $0x44] ss:$24 sps:$4 sm:$0xff]   ;;  %v2377_v34 = vld [vmem:[#allocation5 + $0x128] ss:$24 sps:$4 sm:$0xff]   ;;  %v2374_v37 = vld [vmem:[#allocation5 + $0x74] ss:$24 sps:$4 sm:$0xff]  }
  0x7a   : > { %691 = vmatpush1.bf16.msra.mxu1 %v2357_v17  ;;  %v2380_v38 = vld [vmem:[#allocation5 + $0x158] ss:$24 sps:$4 sm:$0xff]   ;;  %v2384_v41 = vld [vmem:[#allocation5 + $0xa4] ss:$24 sps:$4 sm:$0xff]   ;;  %v2388_v43 = vld [vmem:[#allocation5 + $0xd4] ss:$24 sps:$4 sm:$0xff]  }
  0x7b   : > { %692 = vmatprep.subr.bf16.mxu1 %v2358_v18  ;;  %v2372_v40 = vld [vmem:[#allocation5 + $0x70] ss:$24 sps:$4 sm:$0xff]   ;;  %v2382_v42 = vld [vmem:[#allocation5 + $0xa0] ss:$24 sps:$4 sm:$0xff]   ;;  %v2392_v46 = vld [vmem:[#allocation5 + $0x104] ss:$24 sps:$4 sm:$0xff]  }
  0x7c   : > { %580 = vmatpush1.bf16.msra.mxu0 %v2332_v10  ;;  %v2371_v44 = vld [vmem:[%s2990_s28 + $0x10] sm:$0xff]   ;;  %v2390_v47 = vld [vmem:[#allocation5 + $0x100] ss:$24 sps:$4 sm:$0xff]   ;;  %v2400_v51 = vld [vmem:[#allocation5 + $0x164] ss:$24 sps:$4 sm:$0xff]   ;;  %s2071_s20 = sshll.u32 %s2827_s16, 10 }
  0x7d   : > { %581 = vmatprep.subr.bf16.mxu0 %v2333_v11  ;;  %v2386_v45 = vld [vmem:[#allocation5 + $0xd0] ss:$24 sps:$4 sm:$0xff]   ;;  %v2396_v48 = vld [vmem:[#allocation5 + $0x134] ss:$24 sps:$4 sm:$0xff]   ;;  %v2381_v49 = vld [vmem:[%s2990_s28 + $0x18] sm:$0xff]   ;;  %s1800_s29 = sshll.u32 %s3446_s18, 4  ;;  %s3459_s27 = scalar_lea.hbm %s3510_s3, %s2071_s20  ;;  %s3461_s29 = int_to_ptr.vmem [resolvable:$true] %s1800_s29 }
  0x7e   : > { %693 = vmatpush1.bf16.msra.mxu1 %v2360_v21  ;;  %v2394_v50 = vld [vmem:[#allocation5 + $0x130] ss:$24 sps:$4 sm:$0xff]   ;;  %v2398_v52 = vld [vmem:[#allocation5 + $0x160] ss:$24 sps:$4 sm:$0xff]   ;;  %s1787_s22 = scalar_lea.sflag [#allocation4], %s2984_s4  ;;  %s2703_s16 = scalar_lea.vmem %s3461_s29, 1024 }
  0x7f   : > { %694 = vmatprep.subr.bf16.mxu1 %v2365_v22  ;;  %v2385_v53 = vld [vmem:[%s2990_s28 + $0x20] sm:$0xff]   ;;  %v2389_v54 = vld [vmem:[%s2990_s28 + $0x28] sm:$0xff]   ;;  %v2393_v55 = vld [vmem:[%s2990_s28 + $0x30] sm:$0xff]   ;;  %p2704_p11 = scmp.ne.s32.totalorder %s3461_s29, %s2703_s16  ;;  %p3594_p0 = scmp.ne.s32.totalorder %s3543_s23, 0 }
  0x80   : > { %582 = vmatpush1.bf16.msra.mxu0 %v2335_v14  ;;  %v2397_v56 = vld [vmem:[%s2990_s28 + $0x38] sm:$0xff]   ;;  %v2401_v57 = vld [vmem:[#allocation7 + $0x40] sm:$0xff]   ;;  %v2403_v59 = vld [vmem:[#allocation7 + $0x48] sm:$0xff]   ;;  %s2783_s8 = smov [#allocation8]  }
  0x81   : > { %583 = vmatprep.subr.bf16.mxu0 %v2336_v15  ;;  %v2402_v58 = vld [vmem:[#allocation7] sm:$0xff]   ;;  %v2404_v60 = vld [vmem:[#allocation7 + $0x8] sm:$0xff]   ;;  %v2405_v61 = vld [vmem:[#allocation7 + $0x50] sm:$0xff]   ;;  %p2705_p1 = pnand %p2704_p11, %p3594_p0  ;;  %s2707_s11 = sshll.u32 %s2783_s8, 4  ;;  %s2708_s11 = int_to_ptr.vmem [resolvable:$false] %s2707_s11 }
  0x82   : > { %695 = vmatpush1.bf16.msra.mxu1 %v2367_v25  ;;  %v2406_v62 = vld [vmem:[#allocation7 + $0x10] sm:$0xff]   ;;  %v2407_v63 = vld [vmem:[#allocation7 + $0x58] sm:$0xff]   ;;  %v3042_v2 = vld [vmem:[#allocation7 + $0x80] sm:$0xff]   ;;  %s2709_s25 = scalar_lea.vmem %s2708_s11, 2048  ;;  %p2710_p5 = scmp.lt.s32.totalorder %s3461_s29, %s2708_s11 }
  0x83   : > { %696 = vmatprep.subr.bf16.mxu1 %v2368_v26  ;;  %v2408_v1 = vld [vmem:[#allocation7 + $0x18] sm:$0xff]   ;;  %v2410_v3 = vld [vmem:[#allocation7 + $0x20] sm:$0xff]   ;;  %v3046_v4 = vld [vmem:[#allocation7 + $0x88] sm:$0xff]   ;;  %p2706_p3 = pneg %p2705_p1  ;;  %p2711_p9 = scmp.lt.s32.totalorder %s2709_s25, %s2703_s16 }
  0x84   : > { %584 = vmatpush1.bf16.msra.mxu0 %v2338_v19  ;;  %v2411_v5 = vld [vmem:[#allocation7 + $0x68] sm:$0xff]   ;;  %v3050_v7 = vld [vmem:[#allocation7 + $0x90] sm:$0xff]   ;;  %v3054_v8 = vld [vmem:[#allocation7 + $0x98] sm:$0xff]  }
  0x85   : > { %585 = vmatprep.subr.bf16.mxu0 %v2339_v20  ;;  %v2413_v6 = vld [vmem:[#allocation7 + $0x28] sm:$0xff]   ;;  %3548 = vst [vmem:[#allocation12_spill] sm:$0xff] %v3054_v8  ;;  %v2415_v9 = vld [vmem:[#allocation7 + $0x70] sm:$0xff]   ;;  %v3058_v11 = vld [vmem:[#allocation7 + $0xa0] sm:$0xff]   ;;  %p2712_p12 = por %p2711_p9, %p2710_p5 }
  0x86   : > { %697 = vmatpush1.bf16.msra.mxu1 %v2370_v29  ;;  %v2417_v10 = vld [vmem:[#allocation7 + $0x30] sm:$0xff]   ;;  %3549 = vst [vmem:[#allocation13_spill] sm:$0xff] %v3058_v11  ;;  %v2419_v12 = vld [vmem:[#allocation7 + $0x78] sm:$0xff]   ;;  %v3062_v13 = vld [vmem:[#allocation7 + $0xa8] sm:$0xff]  }
  0x87   : > { %698 = vmatprep.subr.bf16.mxu1 %v2375_v31  ;;  %3550 = vst [vmem:[#allocation14_spill] sm:$0xff] %v3062_v13  ;;  %v2421_v14 = vld [vmem:[#allocation7 + $0x38] sm:$0xff]   ;;  %v3067_v15 = vld [vmem:[#allocation7 + $0xb0] sm:$0xff]   ;;  %p2713_p2 = pnand %p2712_p12, %p2706_p3 }
  0x88   : > { %586 = vmatpush1.bf16.msra.mxu0 %v2341_v23  ;;  %3551 = vst [vmem:[#allocation15_spill] sm:$0xff] %v3067_v15  ;;  %v3071_v16 = vld [vmem:[#allocation7 + $0xb8] sm:$0xff]  }
  0x89   : > { %587 = vmatprep.subr.bf16.mxu0 %v2345_v24  ;;  %3552 = vst [vmem:[#allocation16_spill] sm:$0xff] %v3071_v16 }
  0x8a   : > { %699 = vmatpush1.bf16.msra.mxu1 %v2377_v34 }
  0x8b   : > { %700 = vmatprep.subr.bf16.mxu1 %v2378_v35 }
  0x8c   : > { %588 = vmatpush1.bf16.msra.mxu0 %v2347_v27 }
  0x8d   : > { %799 = vmatprep.subr.bf16.mxu0 %v2354_v28 }
  0x8e   : > { %701 = vmatpush1.bf16.msra.mxu1 %v2380_v38 }
  0x8f   : > { %606 = vmatmul.mubr.bf16.vlgmr.msra.gmra.mrb[0].mxu0 %v3003_v30  ;;  %2119 = vmatprep.subr.bf16.mxu1 %v2401_v57 }
  0x90   : > { %800 = vmatpush1.bf16.msra.mxu0 %v2352_v32  ;;  %615 = vmatprep.mubr.bf16.mxu0 %v2782_v0 }
  0x91   : > { %801 = vmatprep.subr.bf16.mxu0 %v2364_v33  ;;  %719 = vmatmul.mubr.bf16.vlgmr.msra.gmra.mrb[0].mxu1 %v3003_v30 }
  0x92   : > { %728 = vmatprep.mubr.bf16.mxu1 %v2782_v0  ;;  %2120 = vmatpush3.bf16.msra.mxu1 %v2402_v58 }
  0x93   : > { %2121 = vmatprep.subr.bf16.mxu1 %v2403_v59 }
  0x94   : > { %802 = vmatpush1.bf16.msra.mxu0 %v2362_v36 }
  0x95   : > { %803 = vmatprep.subr.bf16.mxu0 %v2374_v37 }
  0x96   : > { %2122 = vmatpush3.bf16.msra.mxu1 %v2404_v60 }
  0x97   : > { %616 = vmatmul.mubr.bf16.gmra.mrb[4].mxu0 %v3008_v39  ;;  %2123 = vmatprep.subr.bf16.mxu1 %v2405_v61 }
  0x98   : > { %625 = vmatprep.mubr.bf16.mxu0 %v2782_v0  ;;  %804 = vmatpush1.bf16.msra.mxu0 %v2372_v40 }
  0x99   : > { %805 = vmatprep.subr.bf16.mxu0 %v2384_v41  ;;  %729 = vmatmul.mubr.bf16.gmra.mrb[4].mxu1 %v3008_v39 }
  0x9a   : > { %738 = vmatprep.mubr.bf16.mxu1 %v2782_v0  ;;  %2124 = vmatpush3.bf16.msra.mxu1 %v2406_v62 }
  0x9b   : > { %2125 = vmatprep.subr.bf16.mxu1 %v2407_v63 }
  0x9c   : > { %806 = vmatpush1.bf16.msra.mxu0 %v2382_v42 }
  0x9d   : > { %807 = vmatprep.subr.bf16.mxu0 %v2388_v43 }
  0x9e   : > { %2126 = vmatpush3.bf16.msra.mxu1 %v2408_v1 }
  0x9f   : > { %626 = vmatmul.mubr.bf16.gmra.mrb[8].mxu0 %v2371_v44 }
  0xa0   : > { %635 = vmatprep.mubr.bf16.mxu0 %v2782_v0  ;;  %808 = vmatpush1.bf16.msra.mxu0 %v2386_v45 }
  0xa1   : > { %809 = vmatprep.subr.bf16.mxu0 %v2392_v46  ;;  %739 = vmatmul.mubr.bf16.gmra.mrb[8].mxu1 %v2371_v44 }
  0xa2   : > { %748 = vmatprep.mubr.bf16.mxu1 %v2782_v0 }
  0xa4   : > { %810 = vmatpush1.bf16.msra.mxu0 %v2390_v47 }
  0xa5   : > { %811 = vmatprep.subr.bf16.mxu0 %v2396_v48 }
  0xa7   : > { %636 = vmatmul.mubr.bf16.gmra.mrb[12].mxu0 %v2381_v49 }
  0xa8   : > { %645 = vmatprep.mubr.bf16.mxu0 %v2782_v0  ;;  %812 = vmatpush1.bf16.msra.mxu0 %v2394_v50 }
  0xa9   : > { %813 = vmatprep.subr.bf16.mxu0 %v2400_v51  ;;  %749 = vmatmul.mubr.bf16.gmra.mrb[12].mxu1 %v2381_v49 }
  0xaa   : > { %758 = vmatprep.mubr.bf16.mxu1 %v2782_v0 }
  0xac   : > { %814 = vmatpush1.bf16.msra.mxu0 %v2398_v52 }
  0xad   : > { %2199 = vmatprep.subr.bf16.mxu0 %v3042_v2 }
  0xaf   : > { %646 = vmatmul.mubr.bf16.gmra.mrb[16].mxu0 %v2385_v53 }
  0xb0   : > { %655 = vmatprep.mubr.bf16.mxu0 %v2782_v0 }
  0xb1   : > { %759 = vmatmul.mubr.bf16.gmra.mrb[16].mxu1 %v2385_v53 }
  0xb2   : > { %768 = vmatprep.mubr.bf16.mxu1 %v2782_v0 }
  0xb7   : > { %656 = vmatmul.mubr.bf16.gmra.mrb[20].mxu0 %v2389_v54 }
  0xb8   : > { %665 = vmatprep.mubr.bf16.mxu0 %v2782_v0 }
  0xb9   : > { %769 = vmatmul.mubr.bf16.gmra.mrb[20].mxu1 %v2389_v54 }
  0xba   : > { %778 = vmatprep.mubr.bf16.mxu1 %v2782_v0 }
  0xbf   : > { %666 = vmatmul.mubr.bf16.gmra.mrb[24].mxu0 %v2393_v55 }
  0xc0   : > { %675 = vmatprep.mubr.bf16.mxu0 %v2782_v0 }
  0xc1   : > { %779 = vmatmul.mubr.bf16.gmra.mrb[24].mxu1 %v2393_v55 }
  0xc2   : > { %788 = vmatprep.mubr.bf16.mxu1 %v2782_v0 }
  0xc7   : > { %676 = vmatmul.mubr.bf16.gmra.mrb[28].mxu0 %v2397_v56 }
  0xc8   : > { %831 = vmatprep.mubr.bf16.mxu0 %v2782_v0 }
  0xc9   : > { %789 = vmatmul.mubr.bf16.gmra.mrb[28].mxu1 %v2397_v56 }
  0xcf   : > { %832 = vmatmul.mubr.bf16.vlgmr.msra.gmra.mrb[32].mxu0 %v3003_v30 }
  0xd0   : > { %841 = vmatprep.mubr.bf16.mxu0 %v2782_v0  ;;  %2200 = vmatpush3.bf16.msra.mxu0 %v3042_v2 }
  0xd1   : > { %2201 = vmatprep.subr.bf16.mxu0 %v3046_v4 }
  0xd4   : > { %2202 = vmatpush3.bf16.msra.mxu0 %v3046_v4 }
  0xd5   : > { %2203 = vmatprep.subr.bf16.mxu0 %v3050_v7 }
  0xd7   : > { %842 = vmatmul.mubr.bf16.gmra.mrb[36].mxu0 %v3008_v39 }
  0xd8   : > { %851 = vmatprep.mubr.bf16.mxu0 %v2782_v0  ;;  %2204 = vmatpush3.bf16.msra.mxu0 %v3050_v7 }
  0xd9   : > { %2205 = vmatprep.subr.bf16.mxu0 %v3054_v8 }
  0xdc   : > { %2206 = vmatpush3.bf16.msra.mxu0 %v3054_v8 }
  0xdd   : > { %2207 = vmatprep.subr.bf16.mxu0 %v3058_v11 }
  0xdf   : > { %852 = vmatmul.mubr.bf16.gmra.mrb[40].mxu0 %v2371_v44 }
  0xe0   : > { %861 = vmatprep.mubr.bf16.mxu0 %v2782_v0  ;;  %2208 = vmatpush3.bf16.msra.mxu0 %v3058_v11 }
  0xe1   : > { %2209 = vmatprep.subr.bf16.mxu0 %v3062_v13 }
  0xe4   : > { %2210 = vmatpush3.bf16.msra.mxu0 %v3062_v13 }
  0xe5   : > { %2211 = vmatprep.subr.bf16.mxu0 %v3067_v15 }
  0xe7   : > { %862 = vmatmul.mubr.bf16.gmra.mrb[44].mxu0 %v2381_v49 }
  0xe8   : > { %871 = vmatprep.mubr.bf16.mxu0 %v2782_v0  ;;  %2212 = vmatpush3.bf16.msra.mxu0 %v3067_v15 }
  0xe9   : > { %2213 = vmatprep.subr.bf16.mxu0 %v3071_v16 }
  0xec   : > { %2214 = vmatpush3.bf16.msra.mxu0 %v3071_v16 }
  0xef   : > { %872 = vmatmul.mubr.bf16.gmra.mrb[48].mxu0 %v2385_v53 }
  0xf0   : > { %881 = vmatprep.mubr.bf16.mxu0 %v2782_v0 }
  0xf7   : > { %882 = vmatmul.mubr.bf16.gmra.mrb[52].mxu0 %v2389_v54 }
  0xf8   : > { %891 = vmatprep.mubr.bf16.mxu0 %v2782_v0 }
  0xff   : > { %892 = vmatmul.mubr.bf16.gmra.mrb[56].mxu0 %v2393_v55 }
 0x100   : > { %901 = vmatprep.mubr.bf16.mxu0 %v2782_v0  ;;  %v2409_v0 = vld [vmem:[#allocation7 + $0x60] sm:$0xff]  }
 0x101   : > { %2127 = vmatprep.subr.bf16.mxu1 %v2409_v0 }
 0x102   : > { %2128 = vmatpush3.bf16.msra.mxu1 %v2410_v3 }
 0x103   : > { %2129 = vmatprep.subr.bf16.mxu1 %v2411_v5 }
 0x106   : > { %2130 = vmatpush3.bf16.msra.mxu1 %v2413_v6 }
 0x107   : > { %902 = vmatmul.mubr.bf16.gmra.mrb[60].mxu0 %v2397_v56  ;;  %2131 = vmatprep.subr.bf16.mxu1 %v2415_v9 }
 0x10a   : > { %2132 = vmatpush3.bf16.msra.mxu1 %v2417_v10 }
 0x10b   : > { %2133 = vmatprep.subr.bf16.mxu1 %v2419_v12 }
 0x10e   : > { %2134 = vmatpush3.bf16.msra.mxu1 %v2421_v14 }
 0x10f   : > { %2231 = vmatprep.subr.bf16.mxu1 %v3042_v2 }
 0x162   : > { %v3075_v17 = vpop.f32.mrb[0].mxu0 }
 0x163   : > { %v1961_v18 = vmul.f32 -1.442695, %v3075_v17  ;;  %v3078_v19 = vpop.f32.mrb[1].mxu0 }
 0x164   : > { %v1962_v20 = vmul.f32 -1.442695, %v3078_v19  ;;  %v3081_v21 = vpop.f32.mrb[2].mxu0  ;;  %v3095_v30 = vpop.f32.mrb[0].mxu1 }
 0x165   : > { %2425 = vpow2.f32 %v1961_v18  ;;  %v1964_v22 = vmul.f32 -1.442695, %v3081_v21  ;;  %v3084_v23 = vpop.f32.mrb[3].mxu0  ;;  %v3100_v33 = vpop.f32.mrb[1].mxu1  ;;  %v1963_v37 = vmul.f32 -1.442695, %v3095_v30 }
 0x166   : > { %v1965_v24 = vmul.f32 -1.442695, %v3084_v23  ;;  %v3103_v35 = vpop.f32.mrb[2].mxu1 }
 0x167   : > { %2427 = vpow2.f32 %v1964_v22  ;;  %v3106_v38 = vpop.f32.mrb[3].mxu1 }
 0x168   : > { %2429 = vpow2.f32 %v1962_v20 }
 0x169   : > { %2431 = vpow2.f32 %v1965_v24 }
 0x16a   : > { %v3087_v25 = vpop.f32.mrb[4].mxu0 }
 0x16b   : > { %v1967_v26 = vmul.f32 -1.442695, %v3087_v25  ;;  %v3090_v27 = vpop.f32.mrb[5].mxu0 }
 0x16c   : > { %v1968_v28 = vmul.f32 -1.442695, %v3090_v27  ;;  %v3093_v29 = vpop.f32.mrb[6].mxu0  ;;  %v3116_v48 = vpop.f32.mrb[4].mxu1 }
 0x16d   : > { %2433 = vpow2.f32 %v1967_v26  ;;  %v1970_v31 = vmul.f32 -1.442695, %v3093_v29  ;;  %v3098_v32 = vpop.f32.mrb[7].mxu0  ;;  %v3121_v52 = vpop.f32.mrb[5].mxu1 }
 0x16e   : > { %2435 = vpow2.f32 %v1968_v28  ;;  %v1971_v34 = vmul.f32 -1.442695, %v3098_v32  ;;  %v3123_v54 = vpop.f32.mrb[6].mxu1 }
 0x16f   : > { %v2426_v36 = vpop.eup %2425  ;;  %2437 = vpow2.f32 %v1970_v31  ;;  %v3126_v57 = vpop.f32.mrb[7].mxu1 }
 0x170   : > { %v1056_v39 = vadd.f32 1.0, %v2426_v36  ;;  %2439 = vpow2.f32 %v1971_v34 }
 0x171   : > { %v2428_v40 = vpop.eup %2427 }
 0x172   : > { %v2430_v41 = vpop.eup %2429  ;;  %2441 = vrcp.f32 %v1056_v39  ;;  %v1059_v42 = vadd.f32 1.0, %v2428_v40  ;;  %v3108_v43 = vpop.f32.mrb[8].mxu0 }
 0x173   : > { %v1973_v44 = vmul.f32 -1.442695, %v3108_v43  ;;  %v3111_v45 = vpop.f32.mrb[9].mxu0  ;;  %2443 = vpow2.f32 %v1963_v37  ;;  %v1057_v49 = vadd.f32 1.0, %v2430_v41  ;;  %v2432_v53 = vpop.eup %2431 }
 0x174   : > { %2445 = vrcp.f32 %v1059_v42  ;;  %v1974_v46 = vmul.f32 -1.442695, %v3111_v45  ;;  %v3114_v47 = vpop.f32.mrb[10].mxu0  ;;  %v1060_v61 = vadd.f32 1.0, %v2432_v53  ;;  %v3135_v10 = vpop.f32.mrb[8].mxu1 }
 0x175   : > { %v1976_v50 = vmul.f32 -1.442695, %v3114_v47  ;;  %v3119_v51 = vpop.f32.mrb[11].mxu0  ;;  %2447 = vpow2.f32 %v1973_v44  ;;  %v3141_v24 = vpop.f32.mrb[9].mxu1 }
 0x176   : > { %2449 = vpow2.f32 %v1974_v46  ;;  %v1977_v56 = vmul.f32 -1.442695, %v3119_v51  ;;  %v3144_v31 = vpop.f32.mrb[10].mxu1 }
 0x177   : > { %v2434_v55 = vpop.eup %2433  ;;  %2451 = vpow2.f32 %v1976_v50  ;;  %v1966_v50 = vmul.f32 -1.442695, %v3103_v35 }
 0x178   : > { %v2436_v58 = vpop.eup %2435  ;;  %v1062_v59 = vadd.f32 1.0, %v2434_v55  ;;  %2453 = vrcp.f32 %v1057_v49 }
 0x179   : > { %v2438_v60 = vpop.eup %2437  ;;  %v1063_v0 = vadd.f32 1.0, %v2436_v58 }
 0x17a   : > { %v2440_v62 = vpop.eup %2439  ;;  %2455 = vrcp.f32 %v1062_v59  ;;  %v1065_v63 = vadd.f32 1.0, %v2438_v60  ;;  %v3128_v1 = vpop.f32.mrb[12].mxu0 }
 0x17b   : > { %2457 = vpow2.f32 %v1977_v56  ;;  %v1979_v3 = vmul.f32 -1.442695, %v3128_v1  ;;  %v3131_v5 = vpop.f32.mrb[13].mxu0  ;;  %v1066_v18 = vadd.f32 1.0, %v2440_v62 }
 0x17c   : > { %3553 = vst [vmem:[#allocation17_spill] sm:$0xff] %v3131_v5  ;;  %v2442_v6 = vpop.eup %2441  ;;  %2459 = vrcp.f32 %v1065_v63  ;;  %v3133_v9 = vpop.f32.mrb[14].mxu0  ;;  %v1980_v28 = vmul.f32 -1.442695, %v3131_v5 }
 0x17d   : > { %v2444_v12 = vpop.eup %2443  ;;  %v1200_v14 = vmul.f32 %v2442_v6, %v3075_v17  ;;  %2461 = vrcp.f32 %v1060_v61  ;;  %v1982_v20 = vmul.f32 -1.442695, %v3133_v9  ;;  %v3139_v22 = vpop.f32.mrb[15].mxu0 }
 0x17e   : > { %3554 = vst [vmem:[#allocation18_spill] sm:$0xff] %v3139_v22  ;;  %v2446_v26 = vpop.eup %2445  ;;  %2463 = vpow2.f32 %v1979_v3  ;;  %v3150_v17 = vpop.f32.mrb[11].mxu1  ;;  %v1058_v39 = vadd.f32 1.0, %v2444_v12  ;;  %v1983_v46 = vmul.f32 -1.442695, %v3139_v22 }
 0x17f   : > { %v1203_v34 = vmul.f32 %v2446_v26, %v3081_v21  ;;  %2465 = vrcp.f32 %v1063_v0  ;;  %v3148_v36 = vmul.f32 %v1200_v14, %v3100_v33  ;;  %v2448_v37 = vpop.eup %2447  ;;  %v3168_v59 = vpop.f32.mrb[12].mxu1  ;;  %v1978_v22 = vmul.f32 -1.442695, %v3144_v31 }
 0x180   : > { %2467 = vpow2.f32 %v1982_v20  ;;  %v2450_v40 = vpop.eup %2449  ;;  %v1068_v41 = vadd.f32 1.0, %v2448_v37  ;;  %3556 = vst [vmem:[#allocation20_spill] sm:$0xff] %v3168_v59  ;;  %v3173_v0 = vpop.f32.mrb[13].mxu1 }
 0x181   : > { %2469 = vrcp.f32 %v1066_v18  ;;  %v3153_v42 = vmul.f32 %v1203_v34, %v3106_v38  ;;  %v2452_v44 = vpop.eup %2451  ;;  %v1069_v62 = vadd.f32 1.0, %v2450_v40  ;;  %v3176_v12 = vpop.f32.mrb[14].mxu1 }
 0x182   : > { %2471 = vpow2.f32 %v1980_v28  ;;  %v3156_v21 = vpop.f32.mrb[16].mxu0  ;;  %v3158_v49 = vpop.eup %2453  ;;  %v1071_v33 = vadd.f32 1.0, %v2452_v44 }
 0x183   : > { %2473 = vrcp.f32 %v1068_v41  ;;  %v3163_v55 = vpop.f32.mrb[17].mxu0  ;;  %v1985_v38 = vmul.f32 -1.442695, %v3156_v21 }
 0x184   : > { %3555 = vst [vmem:[#allocation19_spill] sm:$0xff] %v3163_v55  ;;  %v2456_v56 = vpop.eup %2455  ;;  %2475 = vrcp.f32 %v1058_v39  ;;  %v3166_v58 = vpop.f32.mrb[18].mxu0 }
 0x185   : > { %v2458_v60 = vpop.eup %2457  ;;  %v1206_v61 = vmul.f32 %v2456_v56, %v3087_v25  ;;  %2477 = vrcp.f32 %v1071_v33  ;;  %v3171_v63 = vpop.f32.mrb[19].mxu0  ;;  %v1988_v6 = vmul.f32 -1.442695, %v3166_v58 }
 0x186   : > { %3557 = vst [vmem:[#allocation21_spill] sm:$0xff] %v3171_v63  ;;  %v2460_v3 = vpop.eup %2459  ;;  %2479 = vpow2.f32 %v1983_v46  ;;  %v3184_v25 = vpop.f32.mrb[15].mxu1  ;;  %v1072_v28 = vadd.f32 1.0, %v2458_v60  ;;  %v1986_v46 = vmul.f32 -1.442695, %v3163_v55 }
 0x187   : > { %v3178_v14 = vpop.eup %2461  ;;  %v1209_v18 = vmul.f32 %v2460_v3, %v3093_v29  ;;  %2481 = vpow2.f32 %v1966_v50  ;;  %v3182_v20 = vmul.f32 %v1206_v61, %v3121_v52  ;;  %v1969_v29 = vmul.f32 -1.442695, %v3116_v48  ;;  %v3204_v60 = vpop.f32.mrb[16].mxu1 }
 0x188   : > { %v2464_v26 = vpop.eup %2463  ;;  %2483 = vpow2.f32 %v1985_v38 }
 0x189   : > { %v3186_v34 = vpop.eup %2465  ;;  %2485 = vrcp.f32 %v1069_v62  ;;  %v1074_v37 = vadd.f32 1.0, %v2464_v26  ;;  %v3189_v39 = vmul.f32 %v1209_v18, %v3126_v57  ;;  %v1989_v57 = vmul.f32 -1.442695, %v3171_v63 }
 0x18a   : > { %v2468_v40 = vpop.eup %2467  ;;  %2487 = vpow2.f32 %v1988_v6  ;;  %v3192_v41 = vpop.f32.mrb[20].mxu0  ;;  %v1972_v62 = vmul.f32 -1.442695, %v3123_v54 }
 0x18b   : > { %v3194_v52 = vpop.eup %2469  ;;  %2489 = vrcp.f32 %v1074_v37  ;;  %v1077_v44 = vadd.f32 1.0, %v2468_v40  ;;  %v3199_v50 = vpop.f32.mrb[21].mxu0  ;;  %v1991_v26 = vmul.f32 -1.442695, %v3192_v41 }
 0x18c   : > { %3558 = vst [vmem:[#allocation22_spill] sm:$0xff] %v3199_v50  ;;  %v2472_v56 = vpop.eup %2471  ;;  %2491 = vrcp.f32 %v1072_v28  ;;  %v3202_v38 = vpop.f32.mrb[22].mxu0  ;;  %v1992_v16 = vmul.f32 -1.442695, %v3199_v50 }
 0x18d   : > { %v2474_v61 = vpop.eup %2473  ;;  %2493 = vrcp.f32 %v1077_v44  ;;  %v3207_v3 = vpop.f32.mrb[23].mxu0  ;;  %v1075_v40 = vadd.f32 1.0, %v2472_v56 }
 0x18e   : > { %3559 = vst [vmem:[#allocation23_spill] sm:$0xff] %v3207_v3  ;;  %v3209_v6 = vpop.eup %2475  ;;  %v1212_v18 = vmul.f32 %v2474_v61, %v3108_v43  ;;  %2495 = vpow2.f32 %v1969_v29  ;;  %v3213_v28 = vpop.f32.mrb[17].mxu1 }
 0x18f   : > { %v2478_v37 = vpop.eup %2477  ;;  %2497 = vpow2.f32 %v1986_v46  ;;  %v3215_v33 = vpop.f32.mrb[18].mxu1 }
 0x190   : > { %v2480_v53 = vpop.eup %2479  ;;  %v1215_v44 = vmul.f32 %v2478_v37, %v3114_v47  ;;  %2499 = vpow2.f32 %v1989_v57  ;;  %v3220_v63 = vmul.f32 %v1212_v18, %v3141_v24  ;;  %v3222_v43 = vpop.f32.mrb[19].mxu1  ;;  %v1994_v18 = vmul.f32 -1.442695, %v3202_v38 }
 0x191   : > { %v2482_v29 = vpop.eup %2481  ;;  %2501 = vpow2.f32 %v1972_v62  ;;  %v1078_v50 = vadd.f32 1.0, %v2480_v53 }
 0x192   : > { %3560 = vst [vmem:[#allocation24_spill] sm:$0xff] %v3220_v63  ;;  %v2484_v61 = vpop.eup %2483  ;;  %v1061_v55 = vadd.f32 1.0, %v2482_v29  ;;  %2503 = vpow2.f32 %v1991_v26  ;;  %v3225_v46 = vmul.f32 %v1215_v44, %v3150_v17  ;;  %v3227_v56 = vpop.f32.mrb[24].mxu0  ;;  %v1975_v29 = vmul.f32 -1.442695, %v3135_v10 }
 0x193   : > { %3562 = vst [vmem:[#allocation26_spill] sm:$0xff] %v3227_v56  ;;  %v3229_v15 = vpop.eup %2485  ;;  %2505 = vrcp.f32 %v1075_v40  ;;  %v1080_v47 = vadd.f32 1.0, %v2484_v61  ;;  %v3231_v57 = vpop.f32.mrb[25].mxu0  ;;  %v1995_v63 = vmul.f32 -1.442695, %v3207_v3 }
 0x194   : > { %3561 = vst [vmem:[#allocation25_spill] sm:$0xff] %v3225_v46  ;;  %v2488_v24 = vpop.eup %2487  ;;  %2507 = vpow2.f32 %v1992_v16  ;;  %v3236_v37 = vpop.f32.mrb[26].mxu0 }
 0x195   : > { %3563 = vst [vmem:[#allocation27_spill] sm:$0xff] %v3236_v37  ;;  %v3238_v26 = vpop.f32.mrb[20].mxu1  ;;  %v2490_v17 = vpop.eup %2489  ;;  %2509 = vrcp.f32 %v1080_v47  ;;  %v1083_v44 = vadd.f32 1.0, %v2488_v24 }
 0x196   : > { %v3241_v40 = vpop.f32.mrb[27].mxu0  ;;  %v3243_v61 = vpop.eup %2491  ;;  %v1218_v16 = vmul.f32 %v2490_v17, %v3128_v1  ;;  %2511 = vrcp.f32 %v1061_v55 }
 0x197   : > { %v3246_v13 = vpop.f32.mrb[21].mxu1  ;;  %v2494_v62 = vpop.eup %2493  ;;  %2513 = vrcp.f32 %v1083_v44 }
 0x198   : > { %v3249_v46 = vpop.f32.mrb[22].mxu1  ;;  %v2496_v47 = vpop.eup %2495  ;;  %v1221_v24 = vmul.f32 %v2494_v62, %v3133_v9  ;;  %2515 = vpow2.f32 %v1994_v18  ;;  %v3254_v5 = vmul.f32 %v1218_v16, %v3173_v0 }
 0x199   : > { %3564 = vst [vmem:[#allocation28_spill] sm:$0xff] %v3249_v46  ;;  %v3256_v1 = vpop.f32.mrb[23].mxu1  ;;  %v2498_v53 = vpop.eup %2497  ;;  %v1064_v55 = vadd.f32 1.0, %v2496_v47  ;;  %2517 = vpow2.f32 %v1975_v29 }
 0x19a   : > { %3565 = vst [vmem:[#allocation29_spill] sm:$0xff] %v3254_v5  ;;  %v2500_v17 = vpop.eup %2499  ;;  %2519 = vrcp.f32 %v1078_v50  ;;  %v3259_v44 = vmul.f32 %v1221_v24, %v3184_v25  ;;  %v3261_v3 = vpop.f32.mrb[28].mxu0  ;;  %v1081_v62 = vadd.f32 1.0, %v2498_v53  ;;  %v1997_v24 = vmul.f32 -1.442695, %v3227_v56 }
 0x19b   : > { %v2502_v11 = vpop.eup %2501  ;;  %2521 = vpow2.f32 %v1995_v63  ;;  %v3263_v9 = vpop.f32.mrb[29].mxu0  ;;  %v1084_v8 = vadd.f32 1.0, %v2500_v17  ;;  %v2000_v53 = vmul.f32 -1.442695, %v3236_v37 }
 0x19c   : > { %3566 = vst [vmem:[#allocation30_spill] sm:$0xff] %v3259_v44  ;;  %v2504_v18 = vpop.eup %2503  ;;  %v1067_v0 = vadd.f32 1.0, %v2502_v11  ;;  %2523 = vpow2.f32 %v1978_v22  ;;  %v3267_v47 = vpop.f32.mrb[30].mxu0  ;;  %v1981_v44 = vmul.f32 -1.442695, %v3168_v59 }
 0x19d   : > { %v3269_v29 = vpop.f32.mrb[24].mxu1  ;;  %v3271_v50 = vpop.eup %2505  ;;  %2525 = vrcp.f32 %v1064_v55  ;;  %v1086_v25 = vadd.f32 1.0, %v2504_v18  ;;  %v1201_v55 = vmul.f32 %v3158_v49, %v3078_v19 }
 0x19e   : > { %v3274_v63 = vpop.f32.mrb[31].mxu0  ;;  %v2508_v46 = vpop.eup %2507  ;;  %2527 = vrcp.f32 %v1067_v0  ;;  %v1204_v0 = vmul.f32 %v3178_v14, %v3084_v23 }
 0x19f   : > { %v3276_v11 = vpop.f32.mrb[25].mxu1  ;;  %v2510_v22 = vpop.eup %2509  ;;  %2529 = vrcp.f32 %v1086_v25  ;;  %v1202_v25 = vmul.f32 %v3209_v6, %v3095_v30 }
 0x1a0   : > { %3567 = vst [vmem:[#allocation31_spill] sm:$0xff] %v3276_v11  ;;  %v3279_v16 = vpop.f32.mrb[26].mxu1  ;;  %v2512_v5 = vpop.eup %2511  ;;  %v1224_v18 = vmul.f32 %v2510_v22, %v3156_v21  ;;  %2531 = vrcp.f32 %v1081_v62  ;;  %v1998_v11 = vmul.f32 -1.442695, %v3231_v57  ;;  %v1087_v21 = vadd.f32 1.0, %v2508_v46 }
 0x1a1   : > { %v3285_v56 = vpop.f32.mrb[27].mxu1  ;;  %v2514_v17 = vpop.eup %2513  ;;  %2533 = vpow2.f32 %v1997_v24 }
 0x1a2   : > { %3568 = vst [vmem:[#allocation32_spill] sm:$0xff] %v3285_v56  ;;  %v2516_v37 = vpop.eup %2515  ;;  %v1227_v19 = vmul.f32 %v2514_v17, %v3166_v58  ;;  %2535 = vrcp.f32 %v1084_v8  ;;  %v3294_v49 = vmul.f32 %v1224_v18, %v3213_v28  ;;  %v833_v62 = vpop.f32.mrb[32].mxu0  ;;  %v1205_v56 = vmul.f32 %v2512_v5, %v3103_v35 }
 0x1a3   : > { %v2518_v22 = vpop.eup %2517  ;;  %v1089_v59 = vadd.f32 1.0, %v2516_v37  ;;  %2537 = vpow2.f32 %v2000_v53  ;;  %v1249_v23 = vmul.f32 %v1201_v55, %v833_v62  ;;  %v835_v14 = vpop.f32.mrb[33].mxu0  ;;  %v1984_v37 = vmul.f32 -1.442695, %v3176_v12 }
 0x1a4   : > { %v3297_v30 = vpop.eup %2519  ;;  %v1070_v6 = vadd.f32 1.0, %v2518_v22  ;;  %2539 = vpow2.f32 %v1981_v44  ;;  %v3300_v24 = vmul.f32 %v1227_v19, %v3222_v43  ;;  %v1250_v8 = vmul.f32 %v1202_v25, %v835_v14  ;;  %v837_v58 = vpop.f32.mrb[34].mxu0 }
 0x1a5   : > { %v3302_v46 = vpop.f32.mrb[28].mxu1  ;;  %v2522_v28 = vpop.eup %2521  ;;  %2541 = vrcp.f32 %v1089_v59  ;;  %v1252_v18 = vmul.f32 %v1204_v0, %v837_v58  ;;  %v2003_v19 = vmul.f32 -1.442695, %v3261_v3 }
 0x1a6   : > { %v839_v17 = vpop.f32.mrb[35].mxu0  ;;  %v3304_v35 = vpop.f32.mrb[29].mxu1  ;;  %2543 = vrcp.f32 %v1070_v6  ;;  %v1308_v44 = vpack.c.bf16 %v3300_v24, %v3294_v49  ;;  %v1207_v6 = vmul.f32 %v3186_v34, %v3090_v27  ;;  %v1210_v27 = vmul.f32 %v3194_v52, %v3098_v32 }
 0x1a7   : > { %v2524_v5 = vpop.eup %2523  ;;  %v1253_v53 = vmul.f32 %v1205_v56, %v839_v17  ;;  %v3309_v43 = vpop.f32.mrb[30].mxu1  ;;  %2545 = vrcp.f32 %v1087_v21  ;;  %v1297_v59 = vpack.c.bf16 %v1252_v18, %v1249_v23  ;;  %v2006_v56 = vmul.f32 -1.442695, %v3267_v47 }
 0x1a8   : > { %v2526_v55 = vpop.eup %2525  ;;  %v1073_v25 = vadd.f32 1.0, %v2524_v5  ;;  %v3312_v0 = vpop.f32.mrb[31].mxu1  ;;  %2547 = vpow2.f32 %v1998_v11  ;;  %v3569_v11 = vpack.c.bf16 %v3153_v42, %v3148_v36  ;;  %v1090_v34 = vadd.f32 1.0, %v2522_v28 }
 0x1a9   : > { %v2528_v62 = vpop.eup %2527  ;;  %v1298_v22 = vpack.c.bf16 %v1253_v53, %v1250_v8  ;;  %1544 = vmatprep.mubr.bf16.mxu1 %v1297_v59  ;;  %v1208_v21 = vmul.f32 %v2526_v55, %v3116_v48 }
 0x1aa   : > { %v2530_v14 = vpop.eup %2529  ;;  %2549 = vrcp.f32 %v1073_v25  ;;  %v843_v23 = vpop.f32.mrb[36].mxu0  ;;  %1545 = vmatmul.mubr.bf16.vlgmr.msra.gmra.mrb[32].mxu1 %v3569_v11 }
 0x1ab   : > { %v3317_v58 = vpop.eup %2531  ;;  %v1230_v17 = vmul.f32 %v2530_v14, %v3192_v41  ;;  %2551 = vpow2.f32 %v1984_v37  ;;  %2215 = vmatprep.mubr.bf16.mxu0 %v1298_v22  ;;  %v1255_v18 = vmul.f32 %v1207_v6, %v843_v23  ;;  %v845_v5 = vpop.f32.mrb[37].mxu0  ;;  %2239 = vmatpush3.bf16.msra.mxu1 %v3042_v2  ;;  %v1211_v41 = vmul.f32 %v2528_v62, %v3123_v54 }
 0x1ac   : > { %v2534_v8 = vpop.eup %2533  ;;  %2553 = vpow2.f32 %v2003_v19  ;;  %v1256_v36 = vmul.f32 %v1208_v21, %v845_v5  ;;  %v847_v42 = vpop.f32.mrb[38].mxu0  ;;  %2232 = vmatprep.subr.bf16.mxu1 %v3046_v4  ;;  %v1987_v2 = vmul.f32 -1.442695, %v3204_v60  ;;  %v1990_v6 = vmul.f32 -1.442695, %v3215_v33 }
 0x1ad   : > { %v3327_v48 = vpop.eup %2535  ;;  %v1092_v37 = vadd.f32 1.0, %v2534_v8  ;;  %v3331_v53 = vmul.f32 %v1230_v17, %v3246_v13  ;;  %2555 = vpow2.f32 %v2006_v56  ;;  %v1258_v32 = vmul.f32 %v1210_v27, %v847_v42  ;;  %v849_v52 = vpop.f32.mrb[39].mxu0 }
 0x1ae   : > { %v2538_v55 = vpop.eup %2537  ;;  %v1259_v19 = vmul.f32 %v1211_v41, %v849_v52  ;;  %v2001_v13 = vmul.f32 -1.442695, %v3241_v40  ;;  %v1213_v17 = vmul.f32 %v3229_v15, %v3111_v45  ;;  %v2004_v23 = vmul.f32 -1.442695, %v3263_v9 }
 0x1af   : > { %v2540_v28 = vpop.eup %2539  ;;  %2557 = vrcp.f32 %v1092_v37  ;;  %v1095_v25 = vadd.f32 1.0, %v2538_v55  ;;  %v1300_v62 = vpack.c.bf16 %v1258_v32, %v1255_v18  ;;  %2240 = vmatpush3.bf16.msra.mxu1 %v3046_v4  ;;  %v1216_v45 = vmul.f32 %v3243_v61, %v3119_v51 }
 0x1b0   : > { %v2542_v59 = vpop.eup %2541  ;;  %2559 = vrcp.f32 %v1090_v34  ;;  %v1076_v54 = vadd.f32 1.0, %v2540_v28  ;;  %v1301_v56 = vpack.c.bf16 %v1259_v19, %v1256_v36  ;;  %2233 = vmatprep.subr.bf16.mxu1 %v3050_v7  ;;  %v3570_v34 = vpack.c.bf16 %v3189_v39, %v3182_v20  ;;  %v3571_v39 = vld [vmem:[#allocation12_spill] sm:$0xff] }
 0x1b1   : > { %v2544_v22 = vpop.eup %2543  ;;  %v1233_v14 = vmul.f32 %v2542_v59, %v3202_v38  ;;  %2561 = vrcp.f32 %v1095_v25  ;;  %1552 = vmatprep.mubr.bf16.mxu1 %v1300_v62  ;;  %v1993_v38 = vmul.f32 -1.442695, %v3238_v26  ;;  %v2007_v51 = vmul.f32 -1.442695, %v3274_v63 }
 0x1b2   : > { %v3340_v21 = vpop.eup %2545  ;;  %2563 = vrcp.f32 %v1076_v54  ;;  %v1214_v4 = vmul.f32 %v2544_v22, %v3135_v10  ;;  %v853_v27 = vpop.f32.mrb[40].mxu0  ;;  %1553 = vmatmul.mubr.bf16.gmra.mrb[36].mxu1 %v3570_v34  ;;  %2216 = vmatmul.mubr.bf16.vlgmr.msra.gmra.mrb[64].mxu0 %v1301_v56  ;;  %v1999_v59 = vmul.f32 -1.442695, %v3269_v29  ;;  %v3574_v22 = vld [vmem:[#allocation17_spill] sm:$0xff] }
 0x1b3   : > { %v3345_v11 = vpop.eup %2547  ;;  %2565 = vpow2.f32 %v1987_v2  ;;  %v3350_v8 = vmul.f32 %v1233_v14, %v3256_v1  ;;  %v1261_v18 = vmul.f32 %v1213_v17, %v853_v27  ;;  %v855_v5 = vpop.f32.mrb[41].mxu0  ;;  %2241 = vmatpush3.bf16.msra.mxu1 %v3050_v7  ;;  %v1219_v14 = vmul.f32 %v3271_v50, %v3574_v22 }
 0x1b4   : > { %v2550_v15 = vpop.eup %2549  ;;  %2567 = vpow2.f32 %v2001_v13  ;;  %v1262_v37 = vmul.f32 %v1214_v4, %v855_v5  ;;  %v857_v20 = vpop.f32.mrb[42].mxu0  ;;  %2234 = vmatprep.subr.bf16.mxu1 %v3571_v39  ;;  %v3573_v13 = vld [vmem:[#allocation13_spill] sm:$0xff]  ;;  %v2002_v17 = vmul.f32 -1.442695, %v3279_v16  ;;  %v3576_v4 = vld [vmem:[#allocation18_spill] sm:$0xff]  ;;  %v3580_v5 = vld [vmem:[#allocation27_spill] sm:$0xff] }
 0x1b5   : > { %v2552_v10 = vpop.eup %2551  ;;  %v1217_v41 = vmul.f32 %v2550_v15, %v3144_v31  ;;  %2569 = vpow2.f32 %v1990_v6  ;;  %v1311_v1 = vpack.c.bf16 %v3350_v8, %v3331_v53  ;;  %v1264_v61 = vmul.f32 %v1216_v45, %v857_v20  ;;  %v859_v55 = vpop.f32.mrb[43].mxu0  ;;  %v3572_v31 = vld [vmem:[#allocation28_spill] sm:$0xff]  ;;  %v3575_v6 = vld [vmem:[#allocation26_spill] sm:$0xff]  ;;  %v3577_v15 = vld [vmem:[#allocation25_spill] sm:$0xff] }
 0x1b6   : > { %v2554_v36 = vpop.eup %2553  ;;  %v1079_v42 = vadd.f32 1.0, %v2552_v10  ;;  %2571 = vpow2.f32 %v2004_v23  ;;  %v1996_v28 = vmul.f32 -1.442695, %v3572_v31  ;;  %v2005_v27 = vmul.f32 -1.442695, %v3302_v46  ;;  %v3578_v45 = vld [vmem:[#allocation24_spill] sm:$0xff] }
 0x1b7   : > { %v1098_v32 = vadd.f32 1.0, %v2554_v36  ;;  %2573 = vpow2.f32 %v1993_v38  ;;  %v1265_v7 = vmul.f32 %v1217_v41, %v859_v55  ;;  %v2556_v52 = vpop.eup %2555  ;;  %v1303_v25 = vpack.c.bf16 %v1264_v61, %v1261_v18  ;;  %2242 = vmatpush3.bf16.msra.mxu1 %v3571_v39  ;;  %v3581_v41 = vld [vmem:[#allocation31_spill] sm:$0xff]  ;;  %v3582_v36 = vld [vmem:[#allocation20_spill] sm:$0xff]  ;;  %v3583_v61 = vld [vmem:[#allocation14_spill] sm:$0xff] }
 0x1b8   : > { %2575 = vrcp.f32 %v1079_v42  ;;  %v1101_v19 = vadd.f32 1.0, %v2556_v52  ;;  %2235 = vmatprep.subr.bf16.mxu1 %v3573_v13  ;;  %v1222_v38 = vmul.f32 %v3297_v30, %v3576_v4  ;;  %v3579_v18 = vpack.c.bf16 %v3577_v15, %v3578_v45  ;;  %v3586_v4 = vld [vmem:[#allocation19_spill] sm:$0xff] }
 0x1b9   : > { %v2558_v2 = vpop.eup %2557  ;;  %2577 = vrcp.f32 %v1098_v32  ;;  %v1304_v54 = vpack.c.bf16 %v1265_v7, %v1262_v37  ;;  %1560 = vmatprep.mubr.bf16.mxu1 %v1303_v25  ;;  %v3584_v7 = vld [vmem:[#allocation32_spill] sm:$0xff] }
 0x1ba   : > { %v3367_v62 = vpop.eup %2559  ;;  %v1236_v56 = vmul.f32 %v2558_v2, %v3575_v6  ;;  %2579 = vpow2.f32 %v2007_v51  ;;  %v863_v34 = vpop.f32.mrb[44].mxu0  ;;  %1561 = vmatmul.mubr.bf16.gmra.mrb[40].mxu1 %v3579_v18 }
 0x1bb   : > { %v2562_v23 = vpop.eup %2561  ;;  %2581 = vrcp.f32 %v1101_v19  ;;  %2219 = vmatprep.mubr.bf16.mxu0 %v1304_v54  ;;  %v1267_v20 = vmul.f32 %v1219_v14, %v863_v34  ;;  %v865_v39 = vpop.f32.mrb[45].mxu0  ;;  %2243 = vmatpush3.bf16.msra.mxu1 %v3573_v13  ;;  %v2008_v19 = vmul.f32 -1.442695, %v3309_v43 }
 0x1bc   : > { %v2564_v50 = vpop.eup %2563  ;;  %v1239_v10 = vmul.f32 %v2562_v23, %v3580_v5  ;;  %2583 = vpow2.f32 %v1996_v28  ;;  %v3381_v37 = vmul.f32 %v1236_v56, %v3581_v41  ;;  %v867_v51 = vpop.f32.mrb[46].mxu0  ;;  %2236 = vmatprep.subr.bf16.mxu1 %v3583_v61  ;;  %v1093_v56 = vadd.f32 1.0, %v3345_v11  ;;  %v3588_v5 = vld [vmem:[#allocation29_spill] sm:$0xff] }
 0x1bd   : > { %v2566_v30 = vpop.eup %2565  ;;  %v1220_v42 = vmul.f32 %v2564_v50, %v3582_v36  ;;  %2585 = vpow2.f32 %v1999_v59  ;;  %v1270_v28 = vmul.f32 %v1222_v38, %v867_v51  ;;  %v869_v25 = vpop.f32.mrb[47].mxu0  ;;  %v1225_v38 = vmul.f32 %v3317_v58, %v3586_v4  ;;  %v3587_v50 = vld [vmem:[#allocation30_spill] sm:$0xff]  ;;  %v3590_v41 = vld [vmem:[#allocation21_spill] sm:$0xff]  ;;  %v3591_v51 = vld [vmem:[#allocation16_spill] sm:$0xff] }
 0x1be   : > { %v2568_v55 = vpop.eup %2567  ;;  %v1082_v32 = vadd.f32 1.0, %v2566_v30  ;;  %2587 = vpow2.f32 %v2002_v17  ;;  %v3387_v52 = vmul.f32 %v1239_v10, %v3584_v7  ;;  %v3585_v17 = vld [vmem:[#allocation15_spill] sm:$0xff]  ;;  %v3589_v10 = vpack.c.bf16 %v3587_v50, %v3588_v5 }
 0x1bf   : > { %v2570_v2 = vpop.eup %2569  ;;  %2589 = vpow2.f32 %v2005_v27  ;;  %v1268_v54 = vmul.f32 %v1220_v42, %v865_v39  ;;  %v1306_v14 = vpack.c.bf16 %v1270_v28, %v1267_v20  ;;  %2244 = vmatpush3.bf16.msra.mxu1 %v3583_v61  ;;  %v1096_v15 = vadd.f32 1.0, %v2568_v55 }
 0x1c0   : > { %v2572_v13 = vpop.eup %2571  ;;  %2591 = vrcp.f32 %v1082_v32  ;;  %v1085_v22 = vadd.f32 1.0, %v2570_v2  ;;  %v1314_v59 = vpack.c.bf16 %v3387_v52, %v3381_v37  ;;  %2237 = vmatprep.subr.bf16.mxu1 %v3585_v17  ;;  %v1228_v20 = vmul.f32 %v3327_v48, %v3590_v41 }
 0x1c1   : > { %v2574_v6 = vpop.eup %2573  ;;  %1568 = vmatprep.mubr.bf16.mxu1 %v1306_v14 }
 0x1c2   : > { %v2576_v23 = vpop.eup %2575  ;;  %2593 = vrcp.f32 %v1085_v22  ;;  %v1088_v27 = vadd.f32 1.0, %v2574_v6  ;;  %v873_v18 = vpop.f32.mrb[48].mxu0  ;;  %1569 = vmatmul.mubr.bf16.gmra.mrb[44].mxu1 %v3589_v10 }
 0x1c3   : > { %v2578_v34 = vpop.eup %2577  ;;  %v1223_v45 = vmul.f32 %v2576_v23, %v3176_v12  ;;  %2595 = vpow2.f32 %v2008_v19  ;;  %v1273_v58 = vmul.f32 %v1225_v38, %v873_v18  ;;  %v875_v30 = vpop.f32.mrb[49].mxu0  ;;  %2245 = vmatpush3.bf16.msra.mxu1 %v3585_v17  ;;  %v3592_v17 = vld [vmem:[#allocation22_spill] sm:$0xff] }
 0x1c4   : > { %v2580_v11 = vpop.eup %2579  ;;  %v1242_v39 = vmul.f32 %v2578_v34, %v3261_v3  ;;  %2597 = vrcp.f32 %v1088_v27  ;;  %v877_v42 = vpop.f32.mrb[50].mxu0  ;;  %2238 = vmatprep.subr.bf16.mxu1 %v3591_v51  ;;  %v1231_v23 = vmul.f32 %v3340_v21, %v3592_v17  ;;  %v3593_v34 = vld [vmem:[#allocation23_spill] sm:$0xff] }
 0x1c5   : > { %v2582_v36 = vpop.eup %2581  ;;  %2599 = vrcp.f32 %v1093_v56  ;;  %v1271_v12 = vmul.f32 %v1223_v45, %v869_v25  ;;  %v1276_v48 = vmul.f32 %v1228_v20, %v877_v42  ;;  %v879_v7 = vpop.f32.mrb[51].mxu0  ;;  %v1099_v56 = vadd.f32 1.0, %v2572_v13 }
 0x1c6   : > { %v2584_v61 = vpop.eup %2583  ;;  %v1245_v55 = vmul.f32 %v2582_v36, %v3267_v47  ;;  %v3408_v32 = vmul.f32 %v1242_v39, %v3304_v35  ;;  %2601 = vrcp.f32 %v1096_v15  ;;  %v1102_v38 = vadd.f32 1.0, %v2580_v11 }
 0x1c7   : > { %v2586_v3 = vpop.eup %2585  ;;  %v1091_v28 = vadd.f32 1.0, %v2584_v61  ;;  %v1307_v2 = vpack.c.bf16 %v1271_v12, %v1268_v54  ;;  %v1309_v25 = vpack.c.bf16 %v1276_v48, %v1273_v58  ;;  %2246 = vmatpush3.bf16.msra.mxu1 %v3591_v51  ;;  %v1234_v15 = vmul.f32 %v3367_v62, %v3593_v34 }
 0x1c8   : > { %v2588_v19 = vpop.eup %2587  ;;  %v1094_v22 = vadd.f32 1.0, %v2586_v3  ;;  %v3411_v14 = vmul.f32 %v1245_v55, %v3312_v0 }
 0x1c9   : > { %v2590_v6 = vpop.eup %2589  ;;  %2603 = vrcp.f32 %v1091_v28  ;;  %v1097_v47 = vadd.f32 1.0, %v2588_v19  ;;  %2220 = vmatmul.mubr.bf16.gmra.mrb[68].mxu0 %v1307_v2  ;;  %1576 = vmatprep.mubr.bf16.mxu1 %v1309_v25 }
 0x1ca   : > { %v2592_v35 = vpop.eup %2591  ;;  %2605 = vrcp.f32 %v1094_v22  ;;  %v1100_v4 = vadd.f32 1.0, %v2590_v6  ;;  %v1317_v54 = vpack.c.bf16 %v3411_v14, %v3408_v32  ;;  %v883_v27 = vpop.f32.mrb[52].mxu0  ;;  %1577 = vmatmul.mubr.bf16.gmra.mrb[48].mxu1 %v1308_v44 }
 0x1cb   : > { %v1226_v0 = vmul.f32 %v2592_v35, %v3204_v60  ;;  %2607 = vrcp.f32 %v1097_v47  ;;  %v1279_v21 = vmul.f32 %v1231_v23, %v883_v27  ;;  %v885_v45 = vpop.f32.mrb[53].mxu0 }
 0x1cc   : > { %v2594_v13 = vpop.eup %2593  ;;  %2609 = vrcp.f32 %v1099_v56  ;;  %v887_v10 = vpop.f32.mrb[54].mxu0 }
 0x1cd   : > { %v2596_v18 = vpop.eup %2595  ;;  %v1229_v50 = vmul.f32 %v2594_v13, %v3215_v33  ;;  %v1274_v5 = vmul.f32 %v1226_v0, %v875_v30  ;;  %2611 = vrcp.f32 %v1100_v4  ;;  %v1282_v41 = vmul.f32 %v1234_v15, %v887_v10  ;;  %v889_v20 = vpop.f32.mrb[55].mxu0 }
 0x1ce   : > { %v2598_v60 = vpop.eup %2597  ;;  %v1103_v11 = vadd.f32 1.0, %v2596_v18  ;;  %2613 = vrcp.f32 %v1102_v38 }
 0x1cf   : > { %v2600_v39 = vpop.eup %2599  ;;  %v1232_v49 = vmul.f32 %v2598_v60, %v3238_v26  ;;  %v1277_v24 = vmul.f32 %v1229_v50, %v879_v7  ;;  %v1312_v44 = vpack.c.bf16 %v1282_v41, %v1279_v21 }
 0x1d0   : > { %2615 = vrcp.f32 %v1103_v11  ;;  %v2602_v62 = vpop.eup %2601  ;;  %v1237_v12 = vmul.f32 %v2600_v39, %v3231_v57 }
 0x1d1   : > { %v1310_v58 = vpack.c.bf16 %v1277_v24, %v1274_v5  ;;  %v1280_v36 = vmul.f32 %v1232_v49, %v885_v45  ;;  %1584 = vmatprep.mubr.bf16.mxu1 %v1312_v44  ;;  %v1240_v51 = vmul.f32 %v2602_v62, %v3241_v40 }
 0x1d2   : > { %v893_v30 = vpop.f32.mrb[56].mxu0  ;;  %1585 = vmatmul.mubr.bf16.gmra.mrb[52].mxu1 %v1311_v1 }
 0x1d3   : > { %v2604_v33 = vpop.eup %2603  ;;  %v1285_v61 = vmul.f32 %v1237_v12, %v893_v30  ;;  %v895_v55 = vpop.f32.mrb[57].mxu0 }
 0x1d4   : > { %v2606_v42 = vpop.eup %2605  ;;  %v1235_v26 = vmul.f32 %v2604_v33, %v3572_v31  ;;  %v897_v3 = vpop.f32.mrb[58].mxu0 }
 0x1d5   : > { %v2608_v48 = vpop.eup %2607  ;;  %v1238_v7 = vmul.f32 %v2606_v42, %v3269_v29  ;;  %v1288_v2 = vmul.f32 %v1240_v51, %v897_v3  ;;  %v899_v19 = vpop.f32.mrb[59].mxu0 }
 0x1d6   : > { %v1241_v57 = vmul.f32 %v2608_v48, %v3279_v16  ;;  %v1283_v28 = vmul.f32 %v1235_v26, %v889_v20  ;;  %v2610_v22 = vpop.eup %2609 }
 0x1d7   : > { %v1286_v25 = vmul.f32 %v1238_v7, %v895_v55  ;;  %v2612_v53 = vpop.eup %2611  ;;  %v1315_v1 = vpack.c.bf16 %v1288_v2, %v1285_v61  ;;  %v1243_v31 = vmul.f32 %v2610_v22, %v3263_v9 }
 0x1d8   : > { %v1313_v8 = vpack.c.bf16 %v1283_v28, %v1280_v36  ;;  %v1289_v6 = vmul.f32 %v1241_v57, %v899_v19  ;;  %v2614_v40 = vpop.eup %2613  ;;  %v1244_v29 = vmul.f32 %v2612_v53, %v3302_v46 }
 0x1d9   : > { %1592 = vmatprep.mubr.bf16.mxu1 %v1315_v1  ;;  %v1246_v16 = vmul.f32 %v2614_v40, %v3274_v63 }
 0x1da   : > { %v2616_v56 = vpop.eup %2615  ;;  %v1316_v47 = vpack.c.bf16 %v1289_v6, %v1286_v25  ;;  %v903_v35 = vpop.f32.mrb[60].mxu0  ;;  %1593 = vmatmul.mubr.bf16.gmra.mrb[56].mxu1 %v1314_v59 }
 0x1db   : > { %v1291_v17 = vmul.f32 %v1243_v31, %v903_v35  ;;  %v905_v23 = vpop.f32.mrb[61].mxu0  ;;  %v1247_v4 = vmul.f32 %v2616_v56, %v3309_v43 }
 0x1dc   : > { %v1292_v0 = vmul.f32 %v1244_v29, %v905_v23  ;;  %v907_v38 = vpop.f32.mrb[62].mxu0 }
 0x1dd   : > { %v1294_v27 = vmul.f32 %v1246_v16, %v907_v38  ;;  %v909_v13 = vpop.f32.mrb[63].mxu0 }
 0x1de   : > { %v1295_v9 = vmul.f32 %v1247_v4, %v909_v13 }
 0x1df   : > { %v1318_v34 = vpack.c.bf16 %v1294_v27, %v1291_v17 }
 0x1e0   : > { %v1319_v15 = vpack.c.bf16 %v1295_v9, %v1292_v0 }
 0x1e1   : > { %1600 = vmatprep.mubr.bf16.mxu1 %v1318_v34 }
 0x1e2   : > { %1601 = vmatmul.mubr.bf16.gmra.mrb[60].mxu1 %v1317_v54 }
 0x1e3   : > { %2223 = vmatprep.mubr.bf16.mxu1 %v1310_v58 }
 0x1ea   : > { %2224 = vmatmul.mubr.bf16.vlgmr.msra.gmra.mrb[64].mxu1 %v1313_v8 }
 0x1eb   : > { %2227 = vmatprep.mubr.bf16.mxu1 %v1316_v47 }
 0x1f2   : > { %2228 = vmatmul.mubr.bf16.gmra.mrb[68].mxu1 %v1319_v15 }
 0x27d   : > { %v2135_v63 = vpop.f32.mrb[32].mxu1 }
 0x27e   : > { %v2136_v46 = vpop.f32.mrb[33].mxu1 }
 0x27f   : > { %v2137_v37 = vadd.f32 %v2136_v46, %v2135_v63  ;;  %v2138_v43 = vpop.f32.mrb[34].mxu1 }
 0x280   : > { %v2139_v52 = vpop.f32.mrb[35].mxu1 }
 0x281   : > { %v2140_v59 = vadd.f32 %v2139_v52, %v2138_v43 }
 0x285   : > { %v2141_v21 = vpop.f32.mrb[36].mxu1  ;;  %v2217_v45 = vpop.f32.mrb[64].mxu0 }
 0x286   : > { %v2142_v18 = vpop.f32.mrb[37].mxu1  ;;  %v1643_v50 = vpop.f32.mrb[65].mxu0 }
 0x287   : > { %v2143_v5 = vadd.f32 %v2142_v18, %v2141_v21  ;;  %v1644_v10 = vadd.f32 %v2137_v37, %v1643_v50  ;;  %v2144_v60 = vpop.f32.mrb[38].mxu1  ;;  %v2218_v32 = vpop.f32.mrb[66].mxu0 }
 0x288   : > { %v2145_v14 = vpop.f32.mrb[39].mxu1  ;;  %v1646_v54 = vpop.f32.mrb[67].mxu0 }
 0x289   : > { %v1652_v11 = vadd.f32 %v2217_v45, %v2143_v5  ;;  %v2146_v41 = vadd.f32 %v2145_v14, %v2144_v60  ;;  %v1647_v20 = vadd.f32 %v2140_v59, %v1646_v54 }
 0x28b   : > { %v1655_v39 = vadd.f32 %v2218_v32, %v2146_v41  ;;  %v2075_v49 = vpack.c.bf16 %v1647_v20, %v1644_v10 }
 0x28d   : > { %v2080_v24 = vpack.c.bf16 %v1655_v39, %v1652_v11  ;;  %2076 = vst [vmem:[%s3446_s18] sm:$0xff] %v2075_v49   ;;  %v2147_v44 = vpop.f32.mrb[40].mxu1 }
 0x28e   : > { %v2148_v62 = vpop.f32.mrb[41].mxu1 }
 0x28f   : > { %2112 = vst [vmem:[%s3446_s18 + $0x8] sm:$0xff] %v2080_v24   ;;  %v2149_v58 = vadd.f32 %v2148_v62, %v2147_v44  ;;  %v2150_v36 = vpop.f32.mrb[42].mxu1 }
 0x290   : > { %v2151_v12 = vpop.f32.mrb[43].mxu1 }
 0x291   : > { %v2152_v33 = vadd.f32 %v2151_v12, %v2150_v36 }
 0x295   : > { %v2153_v30 = vpop.f32.mrb[44].mxu1 }
 0x296   : > { %v2154_v42 = vpop.f32.mrb[45].mxu1 }
 0x297   : > { %v2155_v51 = vadd.f32 %v2154_v42, %v2153_v30  ;;  %v2156_v26 = vpop.f32.mrb[46].mxu1 }
 0x298   : > { %v2157_v61 = vpop.f32.mrb[47].mxu1 }
 0x299   : > { %v2158_v55 = vadd.f32 %v2157_v61, %v2156_v26 }
 0x29c   : > { %v2221_v48 = vpop.f32.mrb[68].mxu0 }
 0x29d   : > { %v1668_v7 = vadd.f32 %v2221_v48, %v2155_v51  ;;  %v1659_v3 = vpop.f32.mrb[69].mxu0  ;;  %v2159_v2 = vpop.f32.mrb[48].mxu1 }
 0x29e   : > { %v1660_v57 = vadd.f32 %v2149_v58, %v1659_v3  ;;  %v2222_v28 = vpop.f32.mrb[70].mxu0  ;;  %v2160_v25 = vpop.f32.mrb[49].mxu1 }
 0x29f   : > { %v1671_v19 = vadd.f32 %v2222_v28, %v2158_v55  ;;  %v1662_v22 = vpop.f32.mrb[71].mxu0  ;;  %v2161_v8 = vadd.f32 %v2160_v25, %v2159_v2  ;;  %v2162_v1 = vpop.f32.mrb[50].mxu1 }
 0x2a0   : > { %v1663_v53 = vadd.f32 %v2152_v33, %v1662_v22  ;;  %v2163_v40 = vpop.f32.mrb[51].mxu1 }
 0x2a1   : > { %v2090_v6 = vpack.c.bf16 %v1671_v19, %v1668_v7  ;;  %v2164_v31 = vadd.f32 %v2163_v40, %v2162_v1 }
 0x2a2   : > { %v2085_v56 = vpack.c.bf16 %v1663_v53, %v1660_v57 }
 0x2a3   : > { %2114 = vst [vmem:[%s3446_s18 + $0x18] sm:$0xff] %v2090_v6  }
 0x2a4   : > { %2113 = vst [vmem:[%s3446_s18 + $0x10] sm:$0xff] %v2085_v56  }
 0x2a5   : > { %v2165_v47 = vpop.f32.mrb[52].mxu1 }
 0x2a6   : > { %v2166_v29 = vpop.f32.mrb[53].mxu1 }
 0x2a7   : > { %v2167_v35 = vadd.f32 %v2166_v29, %v2165_v47  ;;  %v2168_v16 = vpop.f32.mrb[54].mxu1 }
 0x2a8   : > { %v2169_v17 = vpop.f32.mrb[55].mxu1 }
 0x2a9   : > { %v2170_v23 = vadd.f32 %v2169_v17, %v2168_v16 }
 0x2ad   : > { %v2171_v4 = vpop.f32.mrb[56].mxu1 }
 0x2ae   : > { %v2172_v0 = vpop.f32.mrb[57].mxu1 }
 0x2af   : > { %v2173_v38 = vadd.f32 %v2172_v0, %v2171_v4  ;;  %v2174_v27 = vpop.f32.mrb[58].mxu1 }
 0x2b0   : > { %v2175_v13 = vpop.f32.mrb[59].mxu1 }
 0x2b1   : > { %v2176_v9 = vadd.f32 %v2175_v13, %v2174_v27 }
 0x2b5   : > { %v2177_v34 = vpop.f32.mrb[60].mxu1 }
 0x2b6   : > { %v2178_v15 = vpop.f32.mrb[61].mxu1 }
 0x2b7   : > { %v2179_v63 = vadd.f32 %v2178_v15, %v2177_v34  ;;  %v2180_v46 = vpop.f32.mrb[62].mxu1 }
 0x2b8   : > { %v2181_v37 = vpop.f32.mrb[63].mxu1 }
 0x2b9   : > { %v2182_v43 = vadd.f32 %v2181_v37, %v2180_v46 }
 0x2bd   : > { %v2225_v52 = vpop.f32.mrb[64].mxu1 }
 0x2be   : > { %v1684_v59 = vadd.f32 %v2225_v52, %v2167_v35  ;;  %v1675_v21 = vpop.f32.mrb[65].mxu1 }
 0x2bf   : > { %v1676_v45 = vadd.f32 %v2161_v8, %v1675_v21  ;;  %v2226_v18 = vpop.f32.mrb[66].mxu1 }
 0x2c0   : > { %v1687_v50 = vadd.f32 %v2226_v18, %v2170_v23  ;;  %v1678_v5 = vpop.f32.mrb[67].mxu1 }
 0x2c1   : > { %v1679_v10 = vadd.f32 %v2164_v31, %v1678_v5 }
 0x2c2   : > { %v2100_v60 = vpack.c.bf16 %v1687_v50, %v1684_v59 }
 0x2c3   : > { %v2095_v32 = vpack.c.bf16 %v1679_v10, %v1676_v45 }
 0x2c4   : > { %2116 = vst [vmem:[%s3446_s18 + $0x28] sm:$0xff] %v2100_v60  }
 0x2c5   : > { %2115 = vst [vmem:[%s3446_s18 + $0x20] sm:$0xff] %v2095_v32   ;;  %v2229_v14 = vpop.f32.mrb[68].mxu1 }
 0x2c6   : > { %v1700_v54 = vadd.f32 %v2229_v14, %v2179_v63  ;;  %v1691_v11 = vpop.f32.mrb[69].mxu1 }
 0x2c7   : > { %v1692_v41 = vadd.f32 %v2173_v38, %v1691_v11  ;;  %v2230_v20 = vpop.f32.mrb[70].mxu1 }
 0x2c8   : > { %v1703_v39 = vadd.f32 %v2230_v20, %v2182_v43  ;;  %v1694_v49 = vpop.f32.mrb[71].mxu1 }
 0x2c9   : > { %v1695_v24 = vadd.f32 %v2176_v9, %v1694_v49 }
 0x2ca   : > { %v2110_v44 = vpack.c.bf16 %v1703_v39, %v1700_v54 }
 0x2cb   : > { %v2105_v62 = vpack.c.bf16 %v1695_v24, %v1692_v41 }
 0x2cc   : > { %2118 = vst [vmem:[%s3446_s18 + $0x38] sm:$0xff] %v2110_v44  }
 0x2cd   : > { %2117 = vst [vmem:[%s3446_s18 + $0x30] sm:$0xff] %v2105_v62  }
 0x2ce   : > { %2716 = shalt.err (!%p2713_p2)
}
 0x2cf   : > { %s2717_s10 = scalar_lea.hbm %s3459_s27, 1024  ;;  %s2721_s26 = scalar_lea.hbm %s3510_s3, 2048 }
 0x2d0   : > { %p2718_p13 = scmp.ne.s32.totalorder %s3459_s27, %s2717_s10  ;;  %p2722_p4 = scmp.lt.u32.totalorder %s3459_s27, %s3510_s3 }
 0x2d1   : > { %p2723_p7 = scmp.lt.u32.totalorder %s2721_s26, %s2717_s10  ;;  %p2725_p11 = scmp.lt.u32.totalorder %s2717_s10, %s3459_s27 }
 0x2d2   : > { %p2719_p6 = pnand %p2718_p13, %p3594_p0 }
 0x2d3   : > { %p2724_p8 = por %p2723_p7, %p2722_p4 }
 0x2d4   : > { %p2720_p10 = pneg %p2719_p6 }
 0x2d5   : > { %p2726_p1 = por %p2725_p11, %p2724_p8 }
 0x2d7   : > { %p2727_p3 = pnand %p2726_p1, %p2720_p10 }
 0x2d9   : > { %2730 = shalt.err (!%p2727_p3)
}
 0x2da   : > { %s2784_s28 = smov 64   ;;  %s2785_s18 = smov 4  }
 0x2db   : > { %2257 = dma.vmem_to_hbm [thread:$0]  (%p3594_p0), %s3461_s29, 1024, %s3459_s27, %s1787_s22, %s2784_s28, %s2784_s28, %s2785_s18  }
 0x2dc PF: > { %s1815_s20 = sand.u32 1, %s2761_s12   ;;  %p3595_p5 = scmp.ne.s32.totalorder %s3539_s19, 0 }
 0x2dd   : > { %p3596_p9 = scmp.ge.s32.totalorder %s2773_s15, 2  ;;  %s1816_s30 = scalar_lea.sflag [#allocation4], %s1815_s20 }
 0x2df   : > { %p2271_p12 = pnand %p3596_p9, %p3595_p5 }
 0x2e1   : > { %2756 = dma.done.wait (!%p2271_p12), %s1816_s30, 1024  }
 0x2e2   : > { %2758 = vsyncadd (!%p2271_p12), %s1816_s30, 4294966272  ;;  %p17_p2 = scmp.ge.s32.totalorder %s2919_s6, 4   ;;  %s3597_s12 = smov %s2765_s13 }
 0x2e3   : > { %s3598_s13 = smov %s2769_s14  ;;  %s3599_s14 = smov %s2928_s9 }
 0x2e4   : > { %s3600_s15 = smov %s2919_s6  ;;  %19 = sbr.rel (!%p17_p2) target bundleno = 6 (0x6), region = 85 }
 0x2eb   :  { %1821 = vsyncpa [#allocation3], 1 }
 0x2ec   :  { %1823 = vsyncpa [#allocation3 + $0x1], 1 }
 0x2ed   :  { %1824 = vsyncpa [#allocation6], 1 }
 0x2ee   :  { %1825 = vsyncpa [#allocation4], 1 }
 0x2ef   :  { %1827 = vsyncpa [#allocation4 + $0x1], 1 }

</bundles_post_ra>
